<compile_context>
chip_gen: v6e
topology: v6e:2x2x1
jax: 0.10.0
libtpu: 0.0.40
codegen_flags: <defaults>
</compile_context>

<pallas_src>
import jax
import jax.numpy as jnp
from jax.experimental import pallas as pl
from jax.experimental.pallas import tpu as pltpu

KH = KW = 5
C_IN = 3
OC = 16
H = W = 24
OH, OW = H - KH + 1, W - KW + 1      # 20, 20
PH, PW = OH // 2, OW // 2            # 10, 10
N_POOL = PH * PW                     # 100
K_CONV = C_IN * KH * KW              # 75
N1, N2, N3 = 120, 10, 2
LANE = 128


def _full_spec(shape):
    nd = len(shape)
    return pl.BlockSpec(shape, lambda i, _nd=nd: (0,) * _nd)


# ---------------- Pallas kernels ----------------

def conv_pool_kernel(p_ref, w_ref, b_ref, o_ref):
    # p_ref: [4, B*PH*PW, 75]  (leading axis = 2x2 pool-window offset)
    # w_ref: [75, 16], b_ref: [1, 16], o_ref: [B*PH*PW, 16]
    w = w_ref[...]
    b = b_ref[...]
    pooled = None
    for widx in range(4):            # static unroll: 4 MXU matmuls + VPU max
        r = jnp.dot(p_ref[widx], w, preferred_element_type=jnp.float32)
        r = jnp.maximum(r + b, 0.0)
        pooled = r if pooled is None else jnp.maximum(pooled, r)
    o_ref[...] = pooled


def mlp_kernel(x_ref, w1_ref, b1_ref, w2_ref, b2_ref, w3_ref, b3_ref, o_ref):
    # x: [B, 1600]; all weights / biases padded to 128 lanes (lane-dense).
    h = jnp.dot(x_ref[...], w1_ref[...], preferred_element_type=jnp.float32)
    h = jnp.maximum(h + b1_ref[...], 0.0)
    h = jnp.dot(h, w2_ref[...], preferred_element_type=jnp.float32)
    h = jnp.maximum(h + b2_ref[...], 0.0)
    o_ref[...] = jnp.dot(h, w3_ref[...], preferred_element_type=jnp.float32) + b3_ref[...]


# ---------------- glue (plain JAX) ----------------

def _im2col_pool_order(x):
    """Patches [4, B*PH*PW, 75]; rows ordered (pool-offset, b, ph, pw),
    columns ordered (c, ki, kj) to match PyTorch OIHW conv weights."""
    B = x.shape[0]
    cols = []
    for ki in range(KH):
        for kj in range(KW):
            cols.append(x[:, :, ki:ki + OH, kj:kj + OW])      # [B, C, OH, OW]
    p = jnp.stack(cols, axis=-1)                               # [B, C, OH, OW, 25]
    p = p.reshape(B, C_IN, PH, 2, PW, 2, KH * KW)              # b c ph dh pw dw k
    p = p.transpose(3, 5, 0, 2, 4, 1, 6)                       # dh dw b ph pw c k
    return p.reshape(4, B * N_POOL, K_CONV)


def prepare_params(params):
    """One-time weight re-layout: fold NCHW flatten into fc1, pad MLP to 128 lanes."""
    wc = params["conv_w"].reshape(OC, K_CONV).T                # [75, 16]
    bc = params["conv_b"].reshape(1, OC)

    # fc1 consumes pooled features in (spatial, channel) order, so permute its
    # columns once; padded rows/cols are zero so results are exact.
    w1 = params["fc1_w"].reshape(N1, OC, N_POOL)               # [n, c, s]
    w1 = w1.transpose(2, 1, 0).reshape(N_POOL * OC, N1)        # [(s*16+c), n]
    w1 = jnp.pad(w1, ((0, 0), (0, LANE - N1)))                 # N 120 -> 128
    b1 = jnp.pad(params["fc1_b"], (0, LANE - N1)).reshape(1, LANE)

    w2 = jnp.pad(params["fc2_w"].T, ((0, LANE - N1), (0, LANE - N2)))  # [128,128]
    b2 = jnp.pad(params["fc2_b"], (0, LANE - N2)).reshape(1, LANE)

    w3 = jnp.pad(params["fc3_w"].T, ((0, LANE - N2), (0, LANE - N3)))  # [128,128]
    b3 = jnp.pad(params["fc3_b"], (0, LANE - N3)).reshape(1, LANE)
    return dict(wc=wc, bc=bc, w1=w1, b1=b1, w2=w2, b2=b2, w3=w3, b3=b3)


@jax.jit
def cnn24_forward(x, prep):
    B = x.shape[0]
    BP = B * N_POOL

    # --- conv1 + ReLU + 2x2 max-pool (one fused Pallas kernel) ---
    patches = _im2col_pool_order(x)                            # [4, BP, 75]
    conv_cost = pl.CostEstimate(
        flops=2 * 4 * BP * K_CONV * OC, transcendentals=0,
        bytes_accessed=4 * (patches.size + prep["wc"].size
                            + prep["bc"].size + BP * OC))
    pooled = pl.pallas_call(
        conv_pool_kernel,
        out_shape=jax.ShapeDtypeStruct((BP, OC), jnp.float32),
        grid=(1,),
        in_specs=[_full_spec(patches.shape),
                  _full_spec((K_CONV, OC)),
                  _full_spec((1, OC))],
        out_specs=_full_spec((BP, OC)),
        compiler_params=pltpu.CompilerParams(dimension_semantics=("arbitrary",)),
        cost_estimate=conv_cost,
    )(patches, prep["wc"], prep["bc"])

    # Flatten: (s, c) column order is already baked into w1 (prepare_params),
    # matching PyTorch's NCHW .view(); this is a 13 KB reshape, no transpose.
    feat = pooled.reshape(B, N_POOL * OC)                      # [B, 1600]

    # --- fc1+ReLU, fc2+ReLU, fc3 (one fused, lane-dense Pallas kernel) ---
    mlp_cost = pl.CostEstimate(
        flops=2 * B * (N_POOL * OC * LANE + LANE * LANE + LANE * LANE),
        transcendentals=0,
        bytes_accessed=4 * (feat.size + prep["w1"].size + prep["w2"].size
                            + prep["w3"].size + 3 * LANE + B * LANE))
    # NOTE: at serving batch sizes, tile the B axis over a grid marked
    # "parallel" (v7x megacore) and re-derive VMEM budget (64 MiB on v7x,
    # 16 MiB default scoped limit on v5e).  At B=2 a single block is optimal.
    out = pl.pallas_call(
        mlp_kernel,
        out_shape=jax.ShapeDtypeStruct((B, LANE), jnp.float32),
        grid=(1,),
        in_specs=[_full_spec((B, N_POOL * OC)),
                  _full_spec(prep["w1"].shape), _full_spec(prep["b1"].shape),
                  _full_spec(prep["w2"].shape), _full_spec(prep["b2"].shape),
                  _full_spec(prep["w3"].shape), _full_spec(prep["b3"].shape)],
        out_specs=_full_spec((B, LANE)),
        compiler_params=pltpu.CompilerParams(dimension_semantics=("arbitrary",)),
        cost_estimate=mlp_cost,
    )(feat, prep["w1"], prep["b1"], prep["w2"], prep["b2"],
      prep["w3"], prep["b3"])
    return out[:, :N3]                                         # [B, 2]


# ---------------- reference (pure JAX) for a sanity check ----------------

def reference_forward(x, params):
    y = jax.lax.conv_general_dilated(
        x, params["conv_w"], (1, 1), "VALID",
        dimension_numbers=("NCHW", "OIHW", "NCHW"))
    y = jax.nn.relu(y + params["conv_b"][None, :, None, None])
    y = jax.lax.reduce_window(y, -jnp.inf, jax.lax.max,
                              (1, 1, 2, 2), (1, 1, 2, 2), "VALID")
    y = y.reshape(y.shape[0], -1)                              # NCHW flatten
    y = jax.nn.relu(y @ params["fc1_w"].T + params["fc1_b"])
    y = jax.nn.relu(y @ params["fc2_w"].T + params["fc2_b"])
    y = y @ params["fc3_w"].T + params["fc3_b"]
    return y


def init_params(key):
    ks = jax.random.split(key, 8)
    return {
        "conv_w": jax.random.normal(ks[0], (OC, C_IN, KH, KW), jnp.float32) * 0.05,
        "conv_b": jax.random.normal(ks[1], (OC,), jnp.float32) * 0.05,
        "fc1_w": jax.random.normal(ks[2], (N1, OC * N_POOL), jnp.float32) * 0.02,
        "fc1_b": jax.random.normal(ks[3], (N1,), jnp.float32) * 0.02,
        "fc2_w": jax.random.normal(ks[4], (N2, N1), jnp.float32) * 0.05,
        "fc2_b": jax.random.normal(ks[5], (N2,), jnp.float32) * 0.05,
        "fc3_w": jax.random.normal(ks[6], (N3, N2), jnp.float32) * 0.1,
        "fc3_b": jax.random.normal(ks[7], (N3,), jnp.float32) * 0.1,
    }


if __name__ == "__main__":
    key = jax.random.PRNGKey(0)
    pkey, xkey = jax.random.split(key)
    params = init_params(pkey)
    # fc1 expects 16*10*10 features => conv input spatial 24x24, 3 channels.
    x = jax.random.normal(xkey, (2, 3, 24, 24), jnp.float32)

    prep = prepare_params(params)          # one-time weight re-layout
    out = jax.block_until_ready(cnn24_forward(x, prep))

    ref = jax.block_until_ready(reference_forward(x, params))
    assert out.shape == (2, 2)
    assert jnp.allclose(out, ref, atol=1e-4, rtol=1e-4), (out, ref)

    print("KERNEL_OK")
</pallas_src>

<mosaic_0001>
module attributes {stable_mosaic.version = 11 : i64} {
  func.func @conv_pool_kernel(%arg0: i32, %arg1: memref<4x200x75xf32, #tpu.memory_space<vmem>>, %arg2: memref<75x16xf32, #tpu.memory_space<vmem>>, %arg3: memref<1x16xf32, #tpu.memory_space<vmem>>, %arg4: memref<200x16xf32, #tpu.memory_space<vmem>>) attributes {dimension_semantics = [#tpu.dimension_semantics<arbitrary>], iteration_bounds = array<i64: 1>, scalar_prefetch = 0 : i64, scratch_operands = 0 : i64, tpu.core_type = #tpu.core_type<tc>, window_params = [{pipeline_mode = #tpu.pipeline_mode<synchronous>, transform_indices = @transform_0, window_bounds = array<i64: 4, 200, 75>}, {pipeline_mode = #tpu.pipeline_mode<synchronous>, transform_indices = @transform_1, window_bounds = array<i64: 75, 16>}, {pipeline_mode = #tpu.pipeline_mode<synchronous>, transform_indices = @transform_2, window_bounds = array<i64: 1, 16>}, {pipeline_mode = #tpu.pipeline_mode<synchronous>, transform_indices = @transform_3, window_bounds = array<i64: 200, 16>}]} {
    %c0 = arith.constant 0 : index
    %c0_0 = arith.constant 0 : index
    %0 = vector.load %arg2[%c0, %c0_0] : memref<75x16xf32, #tpu.memory_space<vmem>>, vector<75x16xf32>
    %c0_1 = arith.constant 0 : index
    %c0_2 = arith.constant 0 : index
    %1 = vector.load %arg3[%c0_1, %c0_2] : memref<1x16xf32, #tpu.memory_space<vmem>>, vector<1x16xf32>
    %c0_3 = arith.constant 0 : index
    %c0_4 = arith.constant 0 : index
    %c0_5 = arith.constant 0 : index
    %2 = vector.load %arg1[%c0_3, %c0_4, %c0_5] : memref<4x200x75xf32, #tpu.memory_space<vmem>>, vector<1x200x75xf32>
    %3 = vector.shape_cast %2 : vector<1x200x75xf32> to vector<200x75xf32>
    %cst = arith.constant dense<0.000000e+00> : vector<200x16xf32>
    %4 = tpu.matmul %3, %0, %cst {dimension_numbers = #tpu.dot_dimension_numbers<[1], [0], [0], [1], [0, 0, 1, 1], [], []>} : vector<200x75xf32>, vector<75x16xf32>, vector<200x16xf32> -> vector<200x16xf32>
    %5 = vector.broadcast %1 : vector<1x16xf32> to vector<200x16xf32>
    %6 = arith.addf %4, %5 : vector<200x16xf32>
    %cst_6 = arith.constant 0.000000e+00 : f32
    %7 = vector.broadcast %cst_6 : f32 to vector<200x16xf32>
    %8 = arith.maximumf %6, %7 : vector<200x16xf32>
    %c1 = arith.constant 1 : index
    %c0_7 = arith.constant 0 : index
    %c0_8 = arith.constant 0 : index
    %9 = vector.load %arg1[%c1, %c0_7, %c0_8] : memref<4x200x75xf32, #tpu.memory_space<vmem>>, vector<1x200x75xf32>
    %10 = vector.shape_cast %9 : vector<1x200x75xf32> to vector<200x75xf32>
    %cst_9 = arith.constant dense<0.000000e+00> : vector<200x16xf32>
    %11 = tpu.matmul %10, %0, %cst_9 {dimension_numbers = #tpu.dot_dimension_numbers<[1], [0], [0], [1], [0, 0, 1, 1], [], []>} : vector<200x75xf32>, vector<75x16xf32>, vector<200x16xf32> -> vector<200x16xf32>
    %12 = vector.broadcast %1 : vector<1x16xf32> to vector<200x16xf32>
    %13 = arith.addf %11, %12 : vector<200x16xf32>
    %cst_10 = arith.constant 0.000000e+00 : f32
    %14 = vector.broadcast %cst_10 : f32 to vector<200x16xf32>
    %15 = arith.maximumf %13, %14 : vector<200x16xf32>
    %16 = arith.maximumf %8, %15 : vector<200x16xf32>
    %c2 = arith.constant 2 : index
    %c0_11 = arith.constant 0 : index
    %c0_12 = arith.constant 0 : index
    %17 = vector.load %arg1[%c2, %c0_11, %c0_12] : memref<4x200x75xf32, #tpu.memory_space<vmem>>, vector<1x200x75xf32>
    %18 = vector.shape_cast %17 : vector<1x200x75xf32> to vector<200x75xf32>
    %cst_13 = arith.constant dense<0.000000e+00> : vector<200x16xf32>
    %19 = tpu.matmul %18, %0, %cst_13 {dimension_numbers = #tpu.dot_dimension_numbers<[1], [0], [0], [1], [0, 0, 1, 1], [], []>} : vector<200x75xf32>, vector<75x16xf32>, vector<200x16xf32> -> vector<200x16xf32>
    %20 = vector.broadcast %1 : vector<1x16xf32> to vector<200x16xf32>
    %21 = arith.addf %19, %20 : vector<200x16xf32>
    %cst_14 = arith.constant 0.000000e+00 : f32
    %22 = vector.broadcast %cst_14 : f32 to vector<200x16xf32>
    %23 = arith.maximumf %21, %22 : vector<200x16xf32>
    %24 = arith.maximumf %16, %23 : vector<200x16xf32>
    %c3 = arith.constant 3 : index
    %c0_15 = arith.constant 0 : index
    %c0_16 = arith.constant 0 : index
    %25 = vector.load %arg1[%c3, %c0_15, %c0_16] : memref<4x200x75xf32, #tpu.memory_space<vmem>>, vector<1x200x75xf32>
    %26 = vector.shape_cast %25 : vector<1x200x75xf32> to vector<200x75xf32>
    %cst_17 = arith.constant dense<0.000000e+00> : vector<200x16xf32>
    %27 = tpu.matmul %26, %0, %cst_17 {dimension_numbers = #tpu.dot_dimension_numbers<[1], [0], [0], [1], [0, 0, 1, 1], [], []>} : vector<200x75xf32>, vector<75x16xf32>, vector<200x16xf32> -> vector<200x16xf32>
    %28 = vector.broadcast %1 : vector<1x16xf32> to vector<200x16xf32>
    %29 = arith.addf %27, %28 : vector<200x16xf32>
    %cst_18 = arith.constant 0.000000e+00 : f32
    %30 = vector.broadcast %cst_18 : f32 to vector<200x16xf32>
    %31 = arith.maximumf %29, %30 : vector<200x16xf32>
    %32 = arith.maximumf %24, %31 : vector<200x16xf32>
    %c0_19 = arith.constant 0 : index
    %c0_20 = arith.constant 0 : index
    %33 = vector.load %arg4[%c0_19, %c0_20] : memref<200x16xf32, #tpu.memory_space<vmem>>, vector<200x16xf32>
    tpu.vector_store %arg4[%c0_19, %c0_20], %32 {strides = array<i32>} : memref<200x16xf32, #tpu.memory_space<vmem>>, vector<200x16xf32>,
    return
  }
  func.func @transform_0(%arg0: i32) -> (i32, i32, i32) {
    %c0_i32 = arith.constant 0 : i32
    %c0_i32_0 = arith.constant 0 : i32
    %c0_i32_1 = arith.constant 0 : i32
    %c0_i32_2 = arith.constant 0 : i32
    return %c0_i32, %c0_i32_0, %c0_i32_1 : i32, i32, i32
  }
  func.func @transform_1(%arg0: i32) -> (i32, i32) {
    %c0_i32 = arith.constant 0 : i32
    %c0_i32_0 = arith.constant 0 : i32
    %c0_i32_1 = arith.constant 0 : i32
    return %c0_i32, %c0_i32_0 : i32, i32
  }
  func.func @transform_2(%arg0: i32) -> (i32, i32) {
    %c0_i32 = arith.constant 0 : i32
    %c0_i32_0 = arith.constant 0 : i32
    %c0_i32_1 = arith.constant 0 : i32
    return %c0_i32, %c0_i32_0 : i32, i32
  }
  func.func @transform_3(%arg0: i32) -> (i32, i32) {
    %c0_i32 = arith.constant 0 : i32
    %c0_i32_0 = arith.constant 0 : i32
    %c0_i32_1 = arith.constant 0 : i32
    return %c0_i32, %c0_i32_0 : i32, i32
  }
}

module attributes {stable_mosaic.version = 11 : i64} {
  func.func @mlp_kernel(%arg0: i32, %arg1: memref<2x1600xf32, #tpu.memory_space<vmem>>, %arg2: memref<1600x128xf32, #tpu.memory_space<vmem>>, %arg3: memref<1x128xf32, #tpu.memory_space<vmem>>, %arg4: memref<128x128xf32, #tpu.memory_space<vmem>>, %arg5: memref<1x128xf32, #tpu.memory_space<vmem>>, %arg6: memref<128x128xf32, #tpu.memory_space<vmem>>, %arg7: memref<1x128xf32, #tpu.memory_space<vmem>>, %arg8: memref<2x128xf32, #tpu.memory_space<vmem>>) attributes {dimension_semantics = [#tpu.dimension_semantics<arbitrary>], iteration_bounds = array<i64: 1>, scalar_prefetch = 0 : i64, scratch_operands = 0 : i64, tpu.core_type = #tpu.core_type<tc>, window_params = [{pipeline_mode = #tpu.pipeline_mode<synchronous>, transform_indices = @transform_0, window_bounds = array<i64: 2, 1600>}, {pipeline_mode = #tpu.pipeline_mode<synchronous>, transform_indices = @transform_1, window_bounds = array<i64: 1600, 128>}, {pipeline_mode = #tpu.pipeline_mode<synchronous>, transform_indices = @transform_2, window_bounds = array<i64: 1, 128>}, {pipeline_mode = #tpu.pipeline_mode<synchronous>, transform_indices = @transform_3, window_bounds = array<i64: 128, 128>}, {pipeline_mode = #tpu.pipeline_mode<synchronous>, transform_indices = @transform_4, window_bounds = array<i64: 1, 128>}, {pipeline_mode = #tpu.pipeline_mode<synchronous>, transform_indices = @transform_5, window_bounds = array<i64: 128, 128>}, {pipeline_mode = #tpu.pipeline_mode<synchronous>, transform_indices = @transform_6, window_bounds = array<i64: 1, 128>}, {pipeline_mode = #tpu.pipeline_mode<synchronous>, transform_indices = @transform_7, window_bounds = array<i64: 2, 128>}]} {
    %c0 = arith.constant 0 : index
    %c0_0 = arith.constant 0 : index
    %0 = vector.load %arg1[%c0, %c0_0] : memref<2x1600xf32, #tpu.memory_space<vmem>>, vector<2x1600xf32>
    %c0_1 = arith.constant 0 : index
    %c0_2 = arith.constant 0 : index
    %1 = vector.load %arg2[%c0_1, %c0_2] : memref<1600x128xf32, #tpu.memory_space<vmem>>, vector<1600x128xf32>
    %cst = arith.constant dense<0.000000e+00> : vector<2x128xf32>
    %2 = tpu.matmul %0, %1, %cst {dimension_numbers = #tpu.dot_dimension_numbers<[1], [0], [0], [1], [0, 0, 1, 1], [], []>} : vector<2x1600xf32>, vector<1600x128xf32>, vector<2x128xf32> -> vector<2x128xf32>
    %c0_3 = arith.constant 0 : index
    %c0_4 = arith.constant 0 : index
    %3 = vector.load %arg3[%c0_3, %c0_4] : memref<1x128xf32, #tpu.memory_space<vmem>>, vector<1x128xf32>
    %4 = vector.broadcast %3 : vector<1x128xf32> to vector<2x128xf32>
    %5 = arith.addf %2, %4 : vector<2x128xf32>
    %cst_5 = arith.constant 0.000000e+00 : f32
    %6 = vector.broadcast %cst_5 : f32 to vector<2x128xf32>
    %7 = arith.maximumf %5, %6 : vector<2x128xf32>
    %c0_6 = arith.constant 0 : index
    %c0_7 = arith.constant 0 : index
    %8 = vector.load %arg4[%c0_6, %c0_7] : memref<128x128xf32, #tpu.memory_space<vmem>>, vector<128x128xf32>
    %cst_8 = arith.constant dense<0.000000e+00> : vector<2x128xf32>
    %9 = tpu.matmul %7, %8, %cst_8 {dimension_numbers = #tpu.dot_dimension_numbers<[1], [0], [0], [1], [0, 0, 1, 1], [], []>} : vector<2x128xf32>, vector<128x128xf32>, vector<2x128xf32> -> vector<2x128xf32>
    %c0_9 = arith.constant 0 : index
    %c0_10 = arith.constant 0 : index
    %10 = vector.load %arg5[%c0_9, %c0_10] : memref<1x128xf32, #tpu.memory_space<vmem>>, vector<1x128xf32>
    %11 = vector.broadcast %10 : vector<1x128xf32> to vector<2x128xf32>
    %12 = arith.addf %9, %11 : vector<2x128xf32>
    %cst_11 = arith.constant 0.000000e+00 : f32
    %13 = vector.broadcast %cst_11 : f32 to vector<2x128xf32>
    %14 = arith.maximumf %12, %13 : vector<2x128xf32>
    %c0_12 = arith.constant 0 : index
    %c0_13 = arith.constant 0 : index
    %15 = vector.load %arg6[%c0_12, %c0_13] : memref<128x128xf32, #tpu.memory_space<vmem>>, vector<128x128xf32>
    %cst_14 = arith.constant dense<0.000000e+00> : vector<2x128xf32>
    %16 = tpu.matmul %14, %15, %cst_14 {dimension_numbers = #tpu.dot_dimension_numbers<[1], [0], [0], [1], [0, 0, 1, 1], [], []>} : vector<2x128xf32>, vector<128x128xf32>, vector<2x128xf32> -> vector<2x128xf32>
    %c0_15 = arith.constant 0 : index
    %c0_16 = arith.constant 0 : index
    %17 = vector.load %arg7[%c0_15, %c0_16] : memref<1x128xf32, #tpu.memory_space<vmem>>, vector<1x128xf32>
    %18 = vector.broadcast %17 : vector<1x128xf32> to vector<2x128xf32>
    %19 = arith.addf %16, %18 : vector<2x128xf32>
    %c0_17 = arith.constant 0 : index
    %c0_18 = arith.constant 0 : index
    %20 = vector.load %arg8[%c0_17, %c0_18] : memref<2x128xf32, #tpu.memory_space<vmem>>, vector<2x128xf32>
    tpu.vector_store %arg8[%c0_17, %c0_18], %19 {strides = array<i32>} : memref<2x128xf32, #tpu.memory_space<vmem>>, vector<2x128xf32>,
    return
  }
  func.func @transform_0(%arg0: i32) -> (i32, i32) {
    %c0_i32 = arith.constant 0 : i32
    %c0_i32_0 = arith.constant 0 : i32
    %c0_i32_1 = arith.constant 0 : i32
    return %c0_i32, %c0_i32_0 : i32, i32
  }
  func.func @transform_1(%arg0: i32) -> (i32, i32) {
    %c0_i32 = arith.constant 0 : i32
    %c0_i32_0 = arith.constant 0 : i32
    %c0_i32_1 = arith.constant 0 : i32
    return %c0_i32, %c0_i32_0 : i32, i32
  }
  func.func @transform_2(%arg0: i32) -> (i32, i32) {
    %c0_i32 = arith.constant 0 : i32
    %c0_i32_0 = arith.constant 0 : i32
    %c0_i32_1 = arith.constant 0 : i32
    return %c0_i32, %c0_i32_0 : i32, i32
  }
  func.func @transform_3(%arg0: i32) -> (i32, i32) {
    %c0_i32 = arith.constant 0 : i32
    %c0_i32_0 = arith.constant 0 : i32
    %c0_i32_1 = arith.constant 0 : i32
    return %c0_i32, %c0_i32_0 : i32, i32
  }
  func.func @transform_4(%arg0: i32) -> (i32, i32) {
    %c0_i32 = arith.constant 0 : i32
    %c0_i32_0 = arith.constant 0 : i32
    %c0_i32_1 = arith.constant 0 : i32
    return %c0_i32, %c0_i32_0 : i32, i32
  }
  func.func @transform_5(%arg0: i32) -> (i32, i32) {
    %c0_i32 = arith.constant 0 : i32
    %c0_i32_0 = arith.constant 0 : i32
    %c0_i32_1 = arith.constant 0 : i32
    return %c0_i32, %c0_i32_0 : i32, i32
  }
  func.func @transform_6(%arg0: i32) -> (i32, i32) {
    %c0_i32 = arith.constant 0 : i32
    %c0_i32_0 = arith.constant 0 : i32
    %c0_i32_1 = arith.constant 0 : i32
    return %c0_i32, %c0_i32_0 : i32, i32
  }
  func.func @transform_7(%arg0: i32) -> (i32, i32) {
    %c0_i32 = arith.constant 0 : i32
    %c0_i32_0 = arith.constant 0 : i32
    %c0_i32_1 = arith.constant 0 : i32
    return %c0_i32, %c0_i32_0 : i32, i32
  }
}

</mosaic_0001>

<bundles_post_ra>
// kernel: cnn24_forward.3
= control target key start
LH: loop header
LB: loop body
LE: loop exit
PB: predicated region body
PF: predicated region fallthrough
CT: control target
= control target key end

     0   :  { %v1384_v27 = vmov 1983009808   ;;  %v246_v29 = vlaneseq  ;;  %s2202_s0 = inlined_call_operand.vmem [shape: f32[2,1600], index: 0, kind: input, shape index: {}]   ;;  %s2203_s1 = inlined_call_operand.vmem [shape: f32[1600,128], index: 1, kind: input, shape index: {}]   ;;  %s2204_s2 = inlined_call_operand.vmem [shape: f32[1,128], index: 2, kind: input, shape index: {}]   ;;  %s2205_s3 = inlined_call_operand.vmem [shape: f32[128,128], index: 3, kind: input, shape index: {}]   ;;  %s2206_s4 = inlined_call_operand.vmem [shape: f32[1,128], index: 4, kind: input, shape index: {}]   ;;  %s2207_s5 = inlined_call_operand.vmem [shape: f32[128,128], index: 5, kind: input, shape index: {}]   ;;  %s2208_s6 = inlined_call_operand.vmem [shape: f32[1,128], index: 6, kind: input, shape index: {}]   ;;  %s2209_s7 = inlined_call_operand.hbm [shape: f32[2,128], index: 7, kind: output, shape index: {}]  }
   0x1   :  { %v62_v0 = vld [vmem:[%s2203_s1 + $0xf8] sm:$0xff]  ;;  %v61_v2 = vld [vmem:[%s2203_s1 + $0xf0] sm:$0xff]  ;;  %v60_v6 = vld [vmem:[%s2203_s1 + $0xe8] sm:$0xff]  ;;  %v244_v28 = vunpack.c.l.s4 %v1384_v27 }
   0x2   :  { %v46_v1 = vld [vmem:[%s2203_s1 + $0x78] sm:$0xff]  ;;  %1013 = vmatprep.subr.mxu0 %v62_v0  ;;  %v45_v4 = vld [vmem:[%s2203_s1 + $0x70] sm:$0xff]  ;;  %v44_v8 = vld [vmem:[%s2203_s1 + $0x68] sm:$0xff]  ;;  %v247_v39 = vshrl.u32 %v246_v29, 7 }
   0x3   :  { %v94_v3 = vld [vmem:[%s2203_s1 + $0x1f8] sm:$0xff]  ;;  %1014 = vmatpush3.msra.mxu0 %v46_v1  ;;  %v93_v7 = vld [vmem:[%s2203_s1 + $0x1f0] sm:$0xff]  ;;  %v92_v10 = vld [vmem:[%s2203_s1 + $0x1e8] sm:$0xff]  ;;  %v245_v38 = vunpack.c.0.s8 %v244_v28 }
   0x4   :  { %v78_v5 = vld [vmem:[%s2203_s1 + $0x178] sm:$0xff]  ;;  %1048 = vmatprep.subr.mxu1 %v94_v3  ;;  %1015 = vmatprep.subr.mxu0 %v61_v2  ;;  %v77_v9 = vld [vmem:[%s2203_s1 + $0x170] sm:$0xff]  ;;  %v59_v11 = vld [vmem:[%s2203_s1 + $0xe0] sm:$0xff] }
   0x5   :  { %1049 = vmatpush3.msra.mxu1 %v78_v5  ;;  %1016 = vmatpush3.msra.mxu0 %v45_v4  ;;  %v76_v12 = vld [vmem:[%s2203_s1 + $0x168] sm:$0xff]  ;;  %v43_v13 = vld [vmem:[%s2203_s1 + $0x60] sm:$0xff]  ;;  %v58_v15 = vld [vmem:[%s2203_s1 + $0xd8] sm:$0xff]  ;;  %v1557_v48 = vsub.s32 %v245_v38, %v247_v39 }
   0x6   :  { %1050 = vmatprep.subr.mxu1 %v93_v7  ;;  %1017 = vmatprep.subr.mxu0 %v60_v6  ;;  %v91_v14 = vld [vmem:[%s2203_s1 + $0x1e0] sm:$0xff]  ;;  %v42_v17 = vld [vmem:[%s2203_s1 + $0x58] sm:$0xff]  ;;  %v57_v19 = vld [vmem:[%s2203_s1 + $0xd0] sm:$0xff] }
   0x7   :  { %1051 = vmatpush3.msra.mxu1 %v77_v9  ;;  %1018 = vmatpush3.msra.mxu0 %v44_v8  ;;  %v75_v16 = vld [vmem:[%s2203_s1 + $0x160] sm:$0xff]  ;;  %v90_v18 = vld [vmem:[%s2203_s1 + $0x1d8] sm:$0xff]  ;;  %v41_v21 = vld [vmem:[%s2203_s1 + $0x50] sm:$0xff] }
   0x8   :  { %1052 = vmatprep.subr.mxu1 %v92_v10  ;;  %1019 = vmatprep.subr.mxu0 %v59_v11  ;;  %v74_v20 = vld [vmem:[%s2203_s1 + $0x158] sm:$0xff]  ;;  %v89_v22 = vld [vmem:[%s2203_s1 + $0x1d0] sm:$0xff]  ;;  %v56_v23 = vld [vmem:[%s2203_s1 + $0xc8] sm:$0xff] }
   0x9   :  { %1053 = vmatpush3.msra.mxu1 %v76_v12  ;;  %1020 = vmatpush3.msra.mxu0 %v43_v13  ;;  %v73_v24 = vld [vmem:[%s2203_s1 + $0x150] sm:$0xff]  ;;  %v40_v25 = vld [vmem:[%s2203_s1 + $0x48] sm:$0xff]  ;;  %v55_v30 = vld [vmem:[%s2203_s1 + $0xc0] sm:$0xff] }
   0xa   :  { %1054 = vmatprep.subr.mxu1 %v91_v14  ;;  %1021 = vmatprep.subr.mxu0 %v58_v15  ;;  %v88_v26 = vld [vmem:[%s2203_s1 + $0x1c8] sm:$0xff]  ;;  %v39_v32 = vld [vmem:[%s2203_s1 + $0x40] sm:$0xff]  ;;  %v54_v34 = vld [vmem:[%s2203_s1 + $0xb8] sm:$0xff] }
   0xb   :  { %1055 = vmatpush3.msra.mxu1 %v75_v16  ;;  %1022 = vmatpush3.msra.mxu0 %v42_v17  ;;  %v72_v31 = vld [vmem:[%s2203_s1 + $0x148] sm:$0xff]  ;;  %v87_v33 = vld [vmem:[%s2203_s1 + $0x1c0] sm:$0xff]  ;;  %v38_v36 = vld [vmem:[%s2203_s1 + $0x38] sm:$0xff] }
   0xc   :  { %1056 = vmatprep.subr.mxu1 %v90_v18  ;;  %1023 = vmatprep.subr.mxu0 %v57_v19  ;;  %v71_v35 = vld [vmem:[%s2203_s1 + $0x140] sm:$0xff]  ;;  %v86_v37 = vld [vmem:[%s2203_s1 + $0x1b8] sm:$0xff]  ;;  %v53_v40 = vld [vmem:[%s2203_s1 + $0xb0] sm:$0xff] }
   0xd   :  { %1057 = vmatpush3.msra.mxu1 %v74_v20  ;;  %1024 = vmatpush3.msra.mxu0 %v41_v21  ;;  %v70_v41 = vld [vmem:[%s2203_s1 + $0x138] sm:$0xff]  ;;  %v37_v42 = vld [vmem:[%s2203_s1 + $0x30] sm:$0xff]  ;;  %v52_v44 = vld [vmem:[%s2203_s1 + $0xa8] sm:$0xff] }
   0xe   :  { %1058 = vmatprep.subr.mxu1 %v89_v22  ;;  %1025 = vmatprep.subr.mxu0 %v56_v23  ;;  %v85_v43 = vld [vmem:[%s2203_s1 + $0x1b0] sm:$0xff]  ;;  %v36_v46 = vld [vmem:[%s2203_s1 + $0x28] sm:$0xff]  ;;  %v51_v49 = vld [vmem:[%s2203_s1 + $0xa0] sm:$0xff] }
   0xf   :  { %1059 = vmatpush3.msra.mxu1 %v73_v24  ;;  %1026 = vmatpush3.msra.mxu0 %v40_v25  ;;  %v69_v45 = vld [vmem:[%s2203_s1 + $0x130] sm:$0xff]  ;;  %v84_v47 = vld [vmem:[%s2203_s1 + $0x1a8] sm:$0xff]  ;;  %v27_v51 = vld [vmem:[%s2202_s0] sm:$0xff] }
  0x10   :  { %1060 = vmatprep.subr.mxu1 %v88_v26  ;;  %1027 = vmatprep.subr.mxu0 %v55_v30  ;;  %v68_v50 = vld [vmem:[%s2203_s1 + $0x128] sm:$0xff]  ;;  %v35_v52 = vld [vmem:[%s2203_s1 + $0x20] sm:$0xff]  ;;  %v50_v54 = vld [vmem:[%s2203_s1 + $0x98] sm:$0xff]  ;;  %v249_v58 = vrot.slane %v27_v51, %v1557_v48  ;;  %v242_v59 = vcombine.high %v27_v51, %v27_v51 }
  0x11   :  { %1061 = vmatpush3.msra.mxu1 %v72_v31  ;;  %1028 = vmatpush3.msra.mxu0 %v39_v32  ;;  %v83_v53 = vld [vmem:[%s2203_s1 + $0x1a0] sm:$0xff]  ;;  %v34_v56 = vld [vmem:[%s2203_s1 + $0x18] sm:$0xff]  ;;  %v49_v60 = vld [vmem:[%s2203_s1 + $0x90] sm:$0xff] }
  0x12   :  { %1062 = vmatprep.subr.mxu1 %v87_v33  ;;  %1029 = vmatprep.subr.mxu0 %v54_v34  ;;  %v67_v55 = vld [vmem:[%s2203_s1 + $0x120] sm:$0xff]  ;;  %v82_v57 = vld [vmem:[%s2203_s1 + $0x198] sm:$0xff]  ;;  %v33_v62 = vld [vmem:[%s2203_s1 + $0x10] sm:$0xff]  ;;  %v257_v4 = vcombine.high %v249_v58, %v249_v58  ;;  %v256_v5 = vrot.slane %v242_v59, %v1557_v48 }
  0x13   :  { %1063 = vmatpush3.msra.mxu1 %v71_v35  ;;  %1030 = vmatpush3.msra.mxu0 %v38_v36  ;;  %v66_v61 = vld [vmem:[%s2203_s1 + $0x118] sm:$0xff]  ;;  %v81_v63 = vld [vmem:[%s2203_s1 + $0x190] sm:$0xff]  ;;  %v48_v0 = vld [vmem:[%s2203_s1 + $0x88] sm:$0xff] }
  0x14   :  { %1064 = vmatprep.subr.mxu1 %v86_v37  ;;  %1031 = vmatprep.subr.mxu0 %v53_v40  ;;  %v65_v1 = vld [vmem:[%s2203_s1 + $0x110] sm:$0xff]  ;;  %v32_v2 = vld [vmem:[%s2203_s1 + $0x8] sm:$0xff]  ;;  %v47_v6 = vld [vmem:[%s2203_s1 + $0x80] sm:$0xff]  ;;  %v258_v12 = vcombine.high %v256_v5, %v256_v5 }
  0x15   :  { %1065 = vmatpush3.msra.mxu1 %v70_v41  ;;  %1032 = vmatpush3.msra.mxu0 %v37_v42  ;;  %v80_v3 = vld [vmem:[%s2203_s1 + $0x188] sm:$0xff]  ;;  %v31_v7 = vld [vmem:[%s2203_s1] sm:$0xff]  ;;  %v126_v10 = vld [vmem:[%s2203_s1 + $0x2f8] sm:$0xff] }
  0x16   :  { %1066 = vmatprep.subr.mxu1 %v85_v43  ;;  %1033 = vmatprep.subr.mxu0 %v52_v44  ;;  %v64_v8 = vld [vmem:[%s2203_s1 + $0x108] sm:$0xff]  ;;  %v79_v9 = vld [vmem:[%s2203_s1 + $0x180] sm:$0xff]  ;;  %v110_v13 = vld [vmem:[%s2203_s1 + $0x278] sm:$0xff] }
  0x17   :  { %1067 = vmatpush3.msra.mxu1 %v69_v45  ;;  %1034 = vmatpush3.msra.mxu0 %v36_v46  ;;  %v63_v11 = vld [vmem:[%s2203_s1 + $0x100] sm:$0xff]  ;;  %v125_v14 = vld [vmem:[%s2203_s1 + $0x2f0] sm:$0xff]  ;;  %v158_v15 = vld [vmem:[%s2203_s1 + $0x3f8] sm:$0xff] }
  0x18   :  { %1068 = vmatprep.subr.mxu1 %v84_v47  ;;  %1035 = vmatprep.subr.mxu0 %v51_v49  ;;  %v109_v16 = vld [vmem:[%s2203_s1 + $0x270] sm:$0xff]  ;;  %v142_v17 = vld [vmem:[%s2203_s1 + $0x378] sm:$0xff]  ;;  %v124_v18 = vld [vmem:[%s2203_s1 + $0x2e8] sm:$0xff] }
  0x19   :  { %1069 = vmatpush3.msra.mxu1 %v68_v50  ;;  %1036 = vmatpush3.msra.mxu0 %v35_v52  ;;  %v157_v19 = vld [vmem:[%s2203_s1 + $0x3f0] sm:$0xff]  ;;  %v108_v20 = vld [vmem:[%s2203_s1 + $0x268] sm:$0xff]  ;;  %v123_v22 = vld [vmem:[%s2203_s1 + $0x2e0] sm:$0xff] }
  0x1a   :  { %1070 = vmatprep.subr.mxu1 %v83_v53  ;;  %1037 = vmatprep.subr.mxu0 %v50_v54  ;;  %v141_v21 = vld [vmem:[%s2203_s1 + $0x370] sm:$0xff]  ;;  %v156_v23 = vld [vmem:[%s2203_s1 + $0x3e8] sm:$0xff]  ;;  %v107_v24 = vld [vmem:[%s2203_s1 + $0x260] sm:$0xff] }
  0x1b   :  { %1071 = vmatpush3.msra.mxu1 %v67_v55  ;;  %1038 = vmatpush3.msra.mxu0 %v34_v56  ;;  %v140_v25 = vld [vmem:[%s2203_s1 + $0x368] sm:$0xff]  ;;  %v122_v26 = vld [vmem:[%s2203_s1 + $0x2d8] sm:$0xff]  ;;  %v155_v27 = vld [vmem:[%s2203_s1 + $0x3e0] sm:$0xff] }
  0x1c   :  { %1072 = vmatprep.subr.mxu1 %v82_v57  ;;  %1039 = vmatprep.subr.mxu0 %v49_v60  ;;  %v106_v28 = vld [vmem:[%s2203_s1 + $0x258] sm:$0xff]  ;;  %v139_v29 = vld [vmem:[%s2203_s1 + $0x360] sm:$0xff]  ;;  %v121_v30 = vld [vmem:[%s2203_s1 + $0x2d0] sm:$0xff] }
  0x1d   :  { %1073 = vmatpush3.msra.mxu1 %v66_v61  ;;  %1040 = vmatpush3.msra.mxu0 %v33_v62  ;;  %v154_v31 = vld [vmem:[%s2203_s1 + $0x3d8] sm:$0xff]  ;;  %v105_v32 = vld [vmem:[%s2203_s1 + $0x250] sm:$0xff]  ;;  %v120_v34 = vld [vmem:[%s2203_s1 + $0x2c8] sm:$0xff] }
  0x1e   :  { %1074 = vmatprep.subr.mxu1 %v81_v63  ;;  %1041 = vmatprep.subr.mxu0 %v48_v0  ;;  %v138_v33 = vld [vmem:[%s2203_s1 + $0x358] sm:$0xff]  ;;  %v153_v35 = vld [vmem:[%s2203_s1 + $0x3d0] sm:$0xff]  ;;  %v104_v36 = vld [vmem:[%s2203_s1 + $0x248] sm:$0xff] }
  0x1f   :  { %1075 = vmatpush3.msra.mxu1 %v65_v1  ;;  %1042 = vmatpush3.msra.mxu0 %v32_v2  ;;  %v137_v37 = vld [vmem:[%s2203_s1 + $0x350] sm:$0xff]  ;;  %v119_v38 = vld [vmem:[%s2203_s1 + $0x2c0] sm:$0xff]  ;;  %v152_v39 = vld [vmem:[%s2203_s1 + $0x3c8] sm:$0xff] }
  0x20   :  { %1076 = vmatprep.subr.mxu1 %v80_v3  ;;  %1043 = vmatprep.subr.mxu0 %v47_v6  ;;  %v103_v40 = vld [vmem:[%s2203_s1 + $0x240] sm:$0xff]  ;;  %v136_v41 = vld [vmem:[%s2203_s1 + $0x348] sm:$0xff]  ;;  %v118_v42 = vld [vmem:[%s2203_s1 + $0x2b8] sm:$0xff] }
  0x21   :  { %379 = vmatprep.mubr.f32.mxu0 %v257_v4  ;;  %1044 = vmatpush3.msra.mxu0 %v31_v7  ;;  %v151_v43 = vld [vmem:[%s2203_s1 + $0x3c0] sm:$0xff]  ;;  %v102_v44 = vld [vmem:[%s2203_s1 + $0x238] sm:$0xff]  ;;  %v117_v46 = vld [vmem:[%s2203_s1 + $0x2b0] sm:$0xff] }
  0x22   :  { %1077 = vmatpush3.msra.mxu1 %v64_v8  ;;  %380 = vmatmul.mubr.f32.vlgmr.msra.gmra.mxu0 %v249_v58  ;;  %v135_v45 = vld [vmem:[%s2203_s1 + $0x340] sm:$0xff]  ;;  %v150_v47 = vld [vmem:[%s2203_s1 + $0x3b8] sm:$0xff]  ;;  %v101_v49 = vld [vmem:[%s2203_s1 + $0x230] sm:$0xff] }
  0x23   :  { %1078 = vmatprep.subr.mxu1 %v79_v9  ;;  %1083 = vmatprep.subr.mxu0 %v126_v10  ;;  %v134_v50 = vld [vmem:[%s2203_s1 + $0x338] sm:$0xff]  ;;  %v116_v51 = vld [vmem:[%s2203_s1 + $0x2a8] sm:$0xff]  ;;  %v149_v52 = vld [vmem:[%s2203_s1 + $0x3b0] sm:$0xff] }
  0x24   :  { %1079 = vmatpush3.msra.mxu1 %v63_v11  ;;  %449 = vmatprep.mubr.f32.mxu1 %v258_v12  ;;  %v100_v53 = vld [vmem:[%s2203_s1 + $0x228] sm:$0xff]  ;;  %v133_v54 = vld [vmem:[%s2203_s1 + $0x330] sm:$0xff]  ;;  %v115_v55 = vld [vmem:[%s2203_s1 + $0x2a0] sm:$0xff] }
  0x25   :  { %1084 = vmatpush3.msra.mxu0 %v110_v13  ;;  %450 = vmatmul.mubr.f32.vlgmr.msra.gmra.mxu1 %v256_v5  ;;  %v148_v56 = vld [vmem:[%s2203_s1 + $0x3a8] sm:$0xff]  ;;  %v99_v57 = vld [vmem:[%s2203_s1 + $0x220] sm:$0xff]  ;;  %v114_v60 = vld [vmem:[%s2203_s1 + $0x298] sm:$0xff] }
  0x26   :  { %1085 = vmatprep.subr.mxu0 %v125_v14  ;;  %1118 = vmatprep.subr.mxu1 %v158_v15  ;;  %v28_v58 = vld [vmem:[%s2202_s0 + $0x8] sm:$0xff]  ;;  %v147_v61 = vld [vmem:[%s2203_s1 + $0x3a0] sm:$0xff]  ;;  %v98_v62 = vld [vmem:[%s2203_s1 + $0x218] sm:$0xff] }
  0x27   :  { %1086 = vmatpush3.msra.mxu0 %v109_v16  ;;  %1119 = vmatpush3.msra.mxu1 %v142_v17  ;;  %v132_v59 = vld [vmem:[%s2203_s1 + $0x328] sm:$0xff]  ;;  %v131_v63 = vld [vmem:[%s2203_s1 + $0x320] sm:$0xff]  ;;  %v113_v0 = vld [vmem:[%s2203_s1 + $0x290] sm:$0xff]  ;;  %v259_v1 = vcombine.high %v28_v58, %v28_v58  ;;  %v266_v4 = vrot.slane %v28_v58, %v1557_v48 }
  0x28   :  { %1087 = vmatprep.subr.mxu0 %v124_v18  ;;  %1120 = vmatprep.subr.mxu1 %v157_v19  ;;  %v146_v2 = vld [vmem:[%s2203_s1 + $0x398] sm:$0xff]  ;;  %v97_v3 = vld [vmem:[%s2203_s1 + $0x210] sm:$0xff]  ;;  %v112_v6 = vld [vmem:[%s2203_s1 + $0x288] sm:$0xff] }
  0x29   :  { %1088 = vmatpush3.msra.mxu0 %v108_v20  ;;  %1121 = vmatpush3.msra.mxu1 %v141_v21  ;;  %v130_v5 = vld [vmem:[%s2203_s1 + $0x318] sm:$0xff]  ;;  %v145_v7 = vld [vmem:[%s2203_s1 + $0x390] sm:$0xff]  ;;  %v96_v8 = vld [vmem:[%s2203_s1 + $0x208] sm:$0xff]  ;;  %v273_v11 = vrot.slane %v259_v1, %v1557_v48  ;;  %v274_v14 = vcombine.high %v266_v4, %v266_v4 }
  0x2a   :  { %1089 = vmatprep.subr.mxu0 %v123_v22  ;;  %1122 = vmatprep.subr.mxu1 %v156_v23  ;;  %v129_v9 = vld [vmem:[%s2203_s1 + $0x310] sm:$0xff]  ;;  %v111_v10 = vld [vmem:[%s2203_s1 + $0x280] sm:$0xff]  ;;  %v144_v12 = vld [vmem:[%s2203_s1 + $0x388] sm:$0xff] }
  0x2b   :  { %1090 = vmatpush3.msra.mxu0 %v107_v24  ;;  %1123 = vmatpush3.msra.mxu1 %v140_v25  ;;  %v95_v13 = vld [vmem:[%s2203_s1 + $0x200] sm:$0xff]  ;;  %v128_v15 = vld [vmem:[%s2203_s1 + $0x308] sm:$0xff]  ;;  %v190_v17 = vld [vmem:[%s2203_s1 + $0x4f8] sm:$0xff]  ;;  %v275_v19 = vcombine.high %v273_v11, %v273_v11 }
  0x2c   :  { %1091 = vmatprep.subr.mxu0 %v122_v26  ;;  %1124 = vmatprep.subr.mxu1 %v155_v27  ;;  %v143_v16 = vld [vmem:[%s2203_s1 + $0x380] sm:$0xff]  ;;  %v174_v20 = vld [vmem:[%s2203_s1 + $0x478] sm:$0xff]  ;;  %v189_v21 = vld [vmem:[%s2203_s1 + $0x4f0] sm:$0xff] }
  0x2d   :  { %1092 = vmatpush3.msra.mxu0 %v106_v28  ;;  %1125 = vmatpush3.msra.mxu1 %v139_v29  ;;  %v127_v18 = vld [vmem:[%s2203_s1 + $0x300] sm:$0xff]  ;;  %v222_v22 = vld [vmem:[%s2203_s1 + $0x5f8] sm:$0xff]  ;;  %v173_v23 = vld [vmem:[%s2203_s1 + $0x470] sm:$0xff] }
  0x2e   :  { %1093 = vmatprep.subr.mxu0 %v121_v30  ;;  %1126 = vmatprep.subr.mxu1 %v154_v31 }
  0x2f   :  { %1094 = vmatpush3.msra.mxu0 %v105_v32  ;;  %1127 = vmatpush3.msra.mxu1 %v138_v33 }
  0x30   :  { %1095 = vmatprep.subr.mxu0 %v120_v34  ;;  %1128 = vmatprep.subr.mxu1 %v153_v35 }
  0x31   :  { %1096 = vmatpush3.msra.mxu0 %v104_v36  ;;  %1129 = vmatpush3.msra.mxu1 %v137_v37 }
  0x32   :  { %1097 = vmatprep.subr.mxu0 %v119_v38  ;;  %1130 = vmatprep.subr.mxu1 %v152_v39 }
  0x33   :  { %1098 = vmatpush3.msra.mxu0 %v103_v40  ;;  %1131 = vmatpush3.msra.mxu1 %v136_v41 }
  0x34   :  { %1099 = vmatprep.subr.mxu0 %v118_v42  ;;  %1132 = vmatprep.subr.mxu1 %v151_v43 }
  0x35   :  { %1100 = vmatpush3.msra.mxu0 %v102_v44  ;;  %1133 = vmatpush3.msra.mxu1 %v135_v45 }
  0x36   :  { %1101 = vmatprep.subr.mxu0 %v117_v46  ;;  %1134 = vmatprep.subr.mxu1 %v150_v47 }
  0x37   :  { %1102 = vmatpush3.msra.mxu0 %v101_v49  ;;  %1135 = vmatpush3.msra.mxu1 %v134_v50 }
  0x38   :  { %1103 = vmatprep.subr.mxu0 %v116_v51  ;;  %1136 = vmatprep.subr.mxu1 %v149_v52 }
  0x39   :  { %1104 = vmatpush3.msra.mxu0 %v100_v53  ;;  %1137 = vmatpush3.msra.mxu1 %v133_v54 }
  0x3a   :  { %1105 = vmatprep.subr.mxu0 %v115_v55  ;;  %1138 = vmatprep.subr.mxu1 %v148_v56 }
  0x3b   :  { %1106 = vmatpush3.msra.mxu0 %v99_v57  ;;  %1139 = vmatpush3.msra.mxu1 %v132_v59 }
  0x3c   :  { %1107 = vmatprep.subr.mxu0 %v114_v60  ;;  %1140 = vmatprep.subr.mxu1 %v147_v61 }
  0x3d   :  { %1108 = vmatpush3.msra.mxu0 %v98_v62  ;;  %1141 = vmatpush3.msra.mxu1 %v131_v63 }
  0x3e   :  { %1109 = vmatprep.subr.mxu0 %v113_v0  ;;  %1142 = vmatprep.subr.mxu1 %v146_v2 }
  0x3f   :  { %1110 = vmatpush3.msra.mxu0 %v97_v3  ;;  %1143 = vmatpush3.msra.mxu1 %v130_v5 }
  0x40   :  { %1111 = vmatprep.subr.mxu0 %v112_v6  ;;  %1144 = vmatprep.subr.mxu1 %v145_v7 }
  0x41   :  { %1112 = vmatpush3.msra.mxu0 %v96_v8  ;;  %1145 = vmatpush3.msra.mxu1 %v129_v9 }
  0x42   :  { %1113 = vmatprep.subr.mxu0 %v111_v10  ;;  %1146 = vmatprep.subr.mxu1 %v144_v12 }
  0x43   :  { %1114 = vmatpush3.msra.mxu0 %v95_v13  ;;  %519 = vmatprep.mubr.f32.mxu0 %v274_v14 }
  0x44   :  { %1147 = vmatpush3.msra.mxu1 %v128_v15  ;;  %520 = vmatmul.mubr.f32.vlgmr.msra.gmra.mxu0 %v266_v4 }
  0x45   :  { %1148 = vmatprep.subr.mxu1 %v143_v16  ;;  %1153 = vmatprep.subr.mxu0 %v190_v17 }
  0x46   :  { %1149 = vmatpush3.msra.mxu1 %v127_v18 }
  0x47   :  { %12 = vsyncpa [#allocation3], 0  ;;  %589 = vmatprep.mubr.f32.mxu1 %v275_v19  ;;  %1154 = vmatpush3.msra.mxu0 %v174_v20  ;;  %v206_v24 = vld [vmem:[%s2203_s1 + $0x578] sm:$0xff]  ;;  %v188_v25 = vld [vmem:[%s2203_s1 + $0x4e8] sm:$0xff]  ;;  %vm1386_vm0 = vmmov 0   ;;  %vm312_vm1 = vcmask 523264  }
  0x48   :  { %590 = vmatmul.mubr.f32.vlgmr.msra.gmra.mxu1 %v273_v11  ;;  %1155 = vmatprep.subr.mxu0 %v189_v21  ;;  %v221_v26 = vld [vmem:[%s2203_s1 + $0x5f0] sm:$0xff]  ;;  %v172_v27 = vld [vmem:[%s2203_s1 + $0x468] sm:$0xff]  ;;  %v187_v29 = vld [vmem:[%s2203_s1 + $0x4e0] sm:$0xff]  ;;  %s1387_s10 = smov [#allocation2]  }
  0x49   :  { %1188 = vmatprep.subr.mxu1 %v222_v22  ;;  %1156 = vmatpush3.msra.mxu0 %v173_v23  ;;  %v205_v28 = vld [vmem:[%s2203_s1 + $0x570] sm:$0xff]  ;;  %v220_v30 = vld [vmem:[%s2203_s1 + $0x5e8] sm:$0xff]  ;;  %v171_v31 = vld [vmem:[%s2203_s1 + $0x460] sm:$0xff]  ;;  %s1000_s11 = sshll.u32 %s1387_s10, 4  ;;  %s1001_s11 = int_to_ptr.vmem [resolvable:$true] %s1000_s11 }
  0x4a   :  { %1189 = vmatpush3.msra.mxu1 %v206_v24  ;;  %1157 = vmatprep.subr.mxu0 %v188_v25  ;;  %v204_v32 = vld [vmem:[%s2203_s1 + $0x568] sm:$0xff]  ;;  %v186_v33 = vld [vmem:[%s2203_s1 + $0x4d8] sm:$0xff]  ;;  %v219_v34 = vld [vmem:[%s2203_s1 + $0x5e0] sm:$0xff]  ;;  %p1367_p1 = scmp.lt.s32.totalorder %s1001_s11, %s1001_s11 }
  0x4b   :  { %1190 = vmatprep.subr.mxu1 %v221_v26  ;;  %1158 = vmatpush3.msra.mxu0 %v172_v27  ;;  %v170_v35 = vld [vmem:[%s2203_s1 + $0x458] sm:$0xff]  ;;  %v203_v36 = vld [vmem:[%s2203_s1 + $0x560] sm:$0xff]  ;;  %v185_v37 = vld [vmem:[%s2203_s1 + $0x4d0] sm:$0xff]  ;;  %v1385_v26 = vmov 0.0  }
  0x4c   :  { %1191 = vmatpush3.msra.mxu1 %v205_v28  ;;  %1159 = vmatprep.subr.mxu0 %v187_v29  ;;  %v218_v38 = vld [vmem:[%s2203_s1 + $0x5d8] sm:$0xff]  ;;  %v169_v39 = vld [vmem:[%s2203_s1 + $0x450] sm:$0xff]  ;;  %v184_v41 = vld [vmem:[%s2203_s1 + $0x4c8] sm:$0xff] }
  0x4d   :  { %1192 = vmatprep.subr.mxu1 %v220_v30  ;;  %1160 = vmatpush3.msra.mxu0 %v171_v31  ;;  %v202_v40 = vld [vmem:[%s2203_s1 + $0x558] sm:$0xff]  ;;  %v217_v42 = vld [vmem:[%s2203_s1 + $0x5d0] sm:$0xff]  ;;  %v168_v43 = vld [vmem:[%s2203_s1 + $0x448] sm:$0xff] }
  0x4e   :  { %1193 = vmatpush3.msra.mxu1 %v204_v32  ;;  %1161 = vmatprep.subr.mxu0 %v186_v33  ;;  %v201_v44 = vld [vmem:[%s2203_s1 + $0x550] sm:$0xff]  ;;  %v183_v45 = vld [vmem:[%s2203_s1 + $0x4c0] sm:$0xff]  ;;  %v216_v46 = vld [vmem:[%s2203_s1 + $0x5c8] sm:$0xff] }
  0x4f   :  { %1194 = vmatprep.subr.mxu1 %v219_v34  ;;  %1162 = vmatpush3.msra.mxu0 %v170_v35  ;;  %v167_v47 = vld [vmem:[%s2203_s1 + $0x440] sm:$0xff]  ;;  %v200_v49 = vld [vmem:[%s2203_s1 + $0x548] sm:$0xff]  ;;  %v182_v50 = vld [vmem:[%s2203_s1 + $0x4b8] sm:$0xff] }
  0x50   :  { %1195 = vmatpush3.msra.mxu1 %v203_v36  ;;  %1163 = vmatprep.subr.mxu0 %v185_v37  ;;  %v215_v51 = vld [vmem:[%s2203_s1 + $0x5c0] sm:$0xff]  ;;  %v166_v52 = vld [vmem:[%s2203_s1 + $0x438] sm:$0xff]  ;;  %v181_v54 = vld [vmem:[%s2203_s1 + $0x4b0] sm:$0xff] }
  0x51   :  { %1196 = vmatprep.subr.mxu1 %v218_v38  ;;  %1164 = vmatpush3.msra.mxu0 %v169_v39  ;;  %v199_v53 = vld [vmem:[%s2203_s1 + $0x540] sm:$0xff]  ;;  %v214_v55 = vld [vmem:[%s2203_s1 + $0x5b8] sm:$0xff]  ;;  %v165_v56 = vld [vmem:[%s2203_s1 + $0x430] sm:$0xff] }
  0x52   :  { %1197 = vmatpush3.msra.mxu1 %v202_v40  ;;  %1165 = vmatprep.subr.mxu0 %v184_v41  ;;  %v198_v57 = vld [vmem:[%s2203_s1 + $0x538] sm:$0xff]  ;;  %v180_v58 = vld [vmem:[%s2203_s1 + $0x4a8] sm:$0xff]  ;;  %v213_v59 = vld [vmem:[%s2203_s1 + $0x5b0] sm:$0xff] }
  0x53   :  { %1198 = vmatprep.subr.mxu1 %v217_v42  ;;  %1166 = vmatpush3.msra.mxu0 %v168_v43  ;;  %v164_v60 = vld [vmem:[%s2203_s1 + $0x428] sm:$0xff]  ;;  %v197_v61 = vld [vmem:[%s2203_s1 + $0x530] sm:$0xff]  ;;  %v179_v62 = vld [vmem:[%s2203_s1 + $0x4a0] sm:$0xff] }
  0x54   :  { %1199 = vmatpush3.msra.mxu1 %v201_v44  ;;  %1167 = vmatprep.subr.mxu0 %v183_v45  ;;  %v212_v63 = vld [vmem:[%s2203_s1 + $0x5a8] sm:$0xff]  ;;  %v163_v0 = vld [vmem:[%s2203_s1 + $0x420] sm:$0xff]  ;;  %v29_v1 = vld [vmem:[%s2202_s0 + $0x10] sm:$0xff] }
  0x55   :  { %1200 = vmatprep.subr.mxu1 %v216_v46  ;;  %1168 = vmatpush3.msra.mxu0 %v167_v47  ;;  %v196_v2 = vld [vmem:[%s2203_s1 + $0x528] sm:$0xff]  ;;  %v178_v3 = vld [vmem:[%s2203_s1 + $0x498] sm:$0xff]  ;;  %v211_v4 = vld [vmem:[%s2203_s1 + $0x5a0] sm:$0xff]  ;;  %v276_v8 = vcombine.high %v29_v1, %v29_v1  ;;  %v283_v11 = vrot.slane %v29_v1, %v1557_v48 }
  0x56   :  { %1201 = vmatpush3.msra.mxu1 %v200_v49  ;;  %1169 = vmatprep.subr.mxu0 %v182_v50  ;;  %v162_v5 = vld [vmem:[%s2203_s1 + $0x418] sm:$0xff]  ;;  %v195_v6 = vld [vmem:[%s2203_s1 + $0x520] sm:$0xff]  ;;  %v177_v7 = vld [vmem:[%s2203_s1 + $0x490] sm:$0xff] }
  0x57   :  { %1202 = vmatprep.subr.mxu1 %v215_v51  ;;  %1170 = vmatpush3.msra.mxu0 %v166_v52  ;;  %v210_v9 = vld [vmem:[%s2203_s1 + $0x598] sm:$0xff]  ;;  %v161_v10 = vld [vmem:[%s2203_s1 + $0x410] sm:$0xff]  ;;  %v176_v13 = vld [vmem:[%s2203_s1 + $0x488] sm:$0xff]  ;;  %v290_v18 = vrot.slane %v276_v8, %v1557_v48  ;;  %v291_v21 = vcombine.high %v283_v11, %v283_v11 }
  0x58   :  { %1203 = vmatpush3.msra.mxu1 %v199_v53  ;;  %1171 = vmatprep.subr.mxu0 %v181_v54  ;;  %v194_v12 = vld [vmem:[%s2203_s1 + $0x518] sm:$0xff]  ;;  %v209_v14 = vld [vmem:[%s2203_s1 + $0x590] sm:$0xff]  ;;  %v160_v15 = vld [vmem:[%s2203_s1 + $0x408] sm:$0xff] }
  0x59   :  { %1204 = vmatprep.subr.mxu1 %v214_v55  ;;  %1172 = vmatpush3.msra.mxu0 %v165_v56  ;;  %v193_v16 = vld [vmem:[%s2203_s1 + $0x510] sm:$0xff]  ;;  %v175_v17 = vld [vmem:[%s2203_s1 + $0x480] sm:$0xff]  ;;  %v208_v19 = vld [vmem:[%s2203_s1 + $0x588] sm:$0xff]  ;;  %v292_v24 = vcombine.high %v290_v18, %v290_v18 }
  0x5a   :  { %1205 = vmatpush3.msra.mxu1 %v198_v57  ;;  %1173 = vmatprep.subr.mxu0 %v180_v58  ;;  %v159_v20 = vld [vmem:[%s2203_s1 + $0x400] sm:$0xff]  ;;  %v192_v22 = vld [vmem:[%s2203_s1 + $0x508] sm:$0xff]  ;;  %v230_v25 = vld [vmem:[%s2203_s1 + $0x638] sm:$0xff] }
  0x5b   :  { %1206 = vmatprep.subr.mxu1 %v213_v59  ;;  %1174 = vmatpush3.msra.mxu0 %v164_v60  ;;  %v207_v48 = vld [vmem:[%s2203_s1 + $0x580] sm:$0xff]  ;;  %v229_v27 = vld [vmem:[%s2203_s1 + $0x630] sm:$0xff]  ;;  %v228_v28 = vld [vmem:[%s2203_s1 + $0x628] sm:$0xff] }
  0x5c   :  { %1207 = vmatpush3.msra.mxu1 %v197_v61  ;;  %1175 = vmatprep.subr.mxu0 %v179_v62  ;;  %v191_v23 = vld [vmem:[%s2203_s1 + $0x500] sm:$0xff]  ;;  %v226_v30 = vld [vmem:[%s2203_s1 + $0x618] sm:$0xff]  ;;  %v225_v31 = vld [vmem:[%s2203_s1 + $0x610] sm:$0xff] }
  0x5d   :  { %1208 = vmatprep.subr.mxu1 %v212_v63  ;;  %1176 = vmatpush3.msra.mxu0 %v163_v0  ;;  %v227_v29 = vld [vmem:[%s2203_s1 + $0x620] sm:$0xff]  ;;  %v224_v32 = vld [vmem:[%s2203_s1 + $0x608] sm:$0xff]  ;;  %v1009_v34 = vld.sshfl [vmem:[%s2202_s0 + $0x18] sm:$0x3 pattern:$0x76325410] }
  0x5e   :  { %1209 = vmatpush3.msra.mxu1 %v196_v2  ;;  %1177 = vmatprep.subr.mxu0 %v178_v3  ;;  %v223_v33 = vld [vmem:[%s2203_s1 + $0x600] sm:$0xff]  ;;  %v821_v35 = vld [vmem:[%s2205_s3 + $0x78] sm:$0xff]  ;;  %v820_v36 = vld [vmem:[%s2205_s3 + $0x70] sm:$0xff] }
  0x5f   :  { %1210 = vmatprep.subr.mxu1 %v211_v4  ;;  %1178 = vmatpush3.msra.mxu0 %v162_v5  ;;  %v819_v37 = vld [vmem:[%s2205_s3 + $0x68] sm:$0xff]  ;;  %v818_v38 = vld [vmem:[%s2205_s3 + $0x60] sm:$0xff]  ;;  %v817_v39 = vld [vmem:[%s2205_s3 + $0x58] sm:$0xff] }
  0x60   :  { %1211 = vmatpush3.msra.mxu1 %v195_v6  ;;  %1179 = vmatprep.subr.mxu0 %v177_v7  ;;  %v816_v40 = vld [vmem:[%s2205_s3 + $0x50] sm:$0xff]  ;;  %v815_v41 = vld [vmem:[%s2205_s3 + $0x48] sm:$0xff]  ;;  %v814_v42 = vld [vmem:[%s2205_s3 + $0x40] sm:$0xff] }
  0x61   :  { %1212 = vmatprep.subr.mxu1 %v210_v9  ;;  %1180 = vmatpush3.msra.mxu0 %v161_v10  ;;  %v813_v43 = vld [vmem:[%s2205_s3 + $0x38] sm:$0xff]  ;;  %v812_v44 = vld [vmem:[%s2205_s3 + $0x30] sm:$0xff]  ;;  %v811_v45 = vld [vmem:[%s2205_s3 + $0x28] sm:$0xff] }
  0x62   :  { %1213 = vmatpush3.msra.mxu1 %v194_v12  ;;  %1181 = vmatprep.subr.mxu0 %v176_v13  ;;  %v810_v46 = vld [vmem:[%s2205_s3 + $0x20] sm:$0xff]  ;;  %v809_v47 = vld [vmem:[%s2205_s3 + $0x18] sm:$0xff]  ;;  %v808_v49 = vld [vmem:[%s2205_s3 + $0x10] sm:$0xff] }
  0x63   :  { %1214 = vmatprep.subr.mxu1 %v209_v14  ;;  %1182 = vmatpush3.msra.mxu0 %v160_v15  ;;  %v807_v50 = vld [vmem:[%s2205_s3 + $0x8] sm:$0xff]  ;;  %v806_v51 = vld [vmem:[%s2205_s3] sm:$0xff]  ;;  %v915_v52 = vld [vmem:[%s2207_s5 + $0x78] sm:$0xff] }
  0x64   :  { %1215 = vmatpush3.msra.mxu1 %v193_v16  ;;  %1183 = vmatprep.subr.mxu0 %v175_v17  ;;  %v914_v53 = vld [vmem:[%s2207_s5 + $0x70] sm:$0xff]  ;;  %v913_v54 = vld [vmem:[%s2207_s5 + $0x68] sm:$0xff]  ;;  %v912_v55 = vld [vmem:[%s2207_s5 + $0x60] sm:$0xff] }
  0x65   :  { %1216 = vmatprep.subr.mxu1 %v208_v19  ;;  %1184 = vmatpush3.msra.mxu0 %v159_v20  ;;  %v911_v56 = vld [vmem:[%s2207_s5 + $0x58] sm:$0xff]  ;;  %v910_v57 = vld [vmem:[%s2207_s5 + $0x50] sm:$0xff]  ;;  %v909_v58 = vld [vmem:[%s2207_s5 + $0x48] sm:$0xff] }
  0x66   :  { %659 = vmatprep.mubr.f32.mxu0 %v291_v21  ;;  %1217 = vmatpush3.msra.mxu1 %v192_v22  ;;  %v908_v59 = vld [vmem:[%s2207_s5 + $0x40] sm:$0xff]  ;;  %v907_v60 = vld [vmem:[%s2207_s5 + $0x38] sm:$0xff]  ;;  %v906_v61 = vld [vmem:[%s2207_s5 + $0x30] sm:$0xff] }
  0x67   :  { %660 = vmatmul.mubr.f32.vlgmr.msra.gmra.mxu0 %v283_v11  ;;  %1218 = vmatprep.subr.mxu1 %v207_v48  ;;  %v905_v62 = vld [vmem:[%s2207_s5 + $0x28] sm:$0xff]  ;;  %v904_v63 = vld [vmem:[%s2207_s5 + $0x20] sm:$0xff]  ;;  %v903_v0 = vld [vmem:[%s2207_s5 + $0x18] sm:$0xff] }
  0x68   :  { %1266 = vmatprep.subr.mxu0 %v1385_v26  ;;  %1219 = vmatpush3.msra.mxu1 %v191_v23  ;;  %v1008_v6 = vld [vmem:[%s2204_s2] ss:$0 sm:$0xff] }
  0x69   :  { %729 = vmatprep.mubr.f32.mxu1 %v292_v24  ;;  %1267 = vmatpush3.msra.mxu0 %v230_v25 }
  0x6a   :  { %730 = vmatmul.mubr.f32.vlgmr.msra.gmra.mxu1 %v290_v18  ;;  %1268 = vmatprep.subr.mxu0 %v1385_v26 }
  0x6b   :  { %1269 = vmatpush3.msra.mxu0 %v229_v27  ;;  %1282 = vmatprep.mubr.msk.f32.mxu0 %vm1386_vm0, %v1385_v26 }
  0x6c   :  { %1270 = vmatprep.subr.mxu0 %v1385_v26  ;;  %1285 = vmatprep.subr.mxu1 %v1385_v26 }
  0x6d   :  { %1271 = vmatpush3.msra.mxu0 %v228_v28  ;;  %1317 = vmatprep.mubr.msk.f32.mxu1 %vm1386_vm0, %v1385_v26 }
  0x6e   :  { %1272 = vmatprep.subr.mxu0 %v1385_v26  ;;  %1286 = vmatpush3.msra.mxu1 %v821_v35 }
  0x6f   :  { %1273 = vmatpush3.msra.mxu0 %v227_v29  ;;  %1287 = vmatprep.subr.mxu1 %v1385_v26 }
  0x70   :  { %1274 = vmatprep.subr.mxu0 %v1385_v26  ;;  %1288 = vmatpush3.msra.mxu1 %v820_v36 }
  0x71   :  { %1275 = vmatpush3.msra.mxu0 %v226_v30  ;;  %1289 = vmatprep.subr.mxu1 %v1385_v26  ;;  %v902_v30 = vld [vmem:[%s2207_s5 + $0x10] sm:$0xff] }
  0x72   :  { %1276 = vmatprep.subr.mxu0 %v1385_v26  ;;  %1290 = vmatpush3.msra.mxu1 %v819_v37 }
  0x73   :  { %1277 = vmatpush3.msra.mxu0 %v225_v31  ;;  %1291 = vmatprep.subr.mxu1 %v1385_v26  ;;  %v901_v31 = vld [vmem:[%s2207_s5 + $0x8] sm:$0xff] }
  0x74   :  { %1278 = vmatprep.subr.mxu0 %v1385_v26  ;;  %1292 = vmatpush3.msra.mxu1 %v818_v38  ;;  %v1012_v38 = vld [vmem:[%s2208_s6] ss:$0 sm:$0xff] }
  0x75   :  { %1279 = vmatpush3.msra.mxu0 %v224_v32  ;;  %1293 = vmatprep.subr.mxu1 %v1385_v26  ;;  %v900_v32 = vld [vmem:[%s2207_s5] sm:$0xff]  ;;  %s1362_s5 = scalar_lea.vmem %s1001_s11, 32 }
  0x76   :  { %1280 = vmatprep.subr.mxu0 %v1385_v26  ;;  %1294 = vmatpush3.msra.mxu1 %v817_v39  ;;  %p1363_p0 = scmp.ne.s32.totalorder %s1001_s11, %s1362_s5  ;;  %p1368_p2 = scmp.lt.s32.totalorder %s1362_s5, %s1362_s5 }
  0x77   :  { %1281 = vmatpush3.msra.mxu0 %v223_v33  ;;  %1295 = vmatprep.subr.mxu1 %v1385_v26  ;;  %v1011_v33 = vld [vmem:[%s2206_s4] ss:$0 sm:$0xff] }
  0x78   :  { %1283 = vmatmul.mubr.msk.f32.vlgmr.msra.gmra.mxu0 %vm312_vm1, %v1009_v34  ;;  %1320 = vmatprep.subr.mxu0 %v1385_v26  ;;  %p1369_p3 = por %p1368_p2, %p1367_p1 }
  0x79   :  { %1352 = vmatprep.mubr.msk.f32.mxu0 %vm1386_vm0, %v1385_v26  ;;  %1296 = vmatpush3.msra.mxu1 %v816_v40 }
  0x7a   :  { %1297 = vmatprep.subr.mxu1 %v1385_v26  ;;  %1321 = vmatpush3.msra.mxu0 %v915_v52  ;;  %p1370_p4 = pnand %p1369_p3, %p1363_p0 }
  0x7b   :  { %1298 = vmatpush3.msra.mxu1 %v815_v41  ;;  %1322 = vmatprep.subr.mxu0 %v1385_v26 }
  0x7c   :  { %1299 = vmatprep.subr.mxu1 %v1385_v26  ;;  %1323 = vmatpush3.msra.mxu0 %v914_v53 }
  0x7d   :  { %1300 = vmatpush3.msra.mxu1 %v814_v42  ;;  %1324 = vmatprep.subr.mxu0 %v1385_v26 }
  0x7e   :  { %1301 = vmatprep.subr.mxu1 %v1385_v26  ;;  %1325 = vmatpush3.msra.mxu0 %v913_v54 }
  0x7f   :  { %1302 = vmatpush3.msra.mxu1 %v813_v43  ;;  %1326 = vmatprep.subr.mxu0 %v1385_v26 }
  0x80   :  { %1303 = vmatprep.subr.mxu1 %v1385_v26  ;;  %1327 = vmatpush3.msra.mxu0 %v912_v55 }
  0x81   :  { %1304 = vmatpush3.msra.mxu1 %v812_v44  ;;  %1328 = vmatprep.subr.mxu0 %v1385_v26 }
  0x82   :  { %1305 = vmatprep.subr.mxu1 %v1385_v26  ;;  %1329 = vmatpush3.msra.mxu0 %v911_v56 }
  0x83   :  { %1306 = vmatpush3.msra.mxu1 %v811_v45  ;;  %1330 = vmatprep.subr.mxu0 %v1385_v26 }
  0x84   :  { %1307 = vmatprep.subr.mxu1 %v1385_v26  ;;  %1331 = vmatpush3.msra.mxu0 %v910_v57 }
  0x85   :  { %1308 = vmatpush3.msra.mxu1 %v810_v46  ;;  %1332 = vmatprep.subr.mxu0 %v1385_v26 }
  0x86   :  { %1309 = vmatprep.subr.mxu1 %v1385_v26  ;;  %1333 = vmatpush3.msra.mxu0 %v909_v58 }
  0x87   :  { %1310 = vmatpush3.msra.mxu1 %v809_v47  ;;  %1334 = vmatprep.subr.mxu0 %v1385_v26 }
  0x88   :  { %1311 = vmatprep.subr.mxu1 %v1385_v26  ;;  %1335 = vmatpush3.msra.mxu0 %v908_v59 }
  0x89   :  { %1312 = vmatpush3.msra.mxu1 %v808_v49  ;;  %1336 = vmatprep.subr.mxu0 %v1385_v26 }
  0x8a   :  { %1313 = vmatprep.subr.mxu1 %v1385_v26  ;;  %1337 = vmatpush3.msra.mxu0 %v907_v60 }
  0x8b   :  { %1314 = vmatpush3.msra.mxu1 %v807_v50  ;;  %1338 = vmatprep.subr.mxu0 %v1385_v26 }
  0x8c   :  { %1315 = vmatprep.subr.mxu1 %v1385_v26  ;;  %1339 = vmatpush3.msra.mxu0 %v906_v61 }
  0x8d   :  { %1316 = vmatpush3.msra.mxu1 %v806_v51  ;;  %1340 = vmatprep.subr.mxu0 %v1385_v26 }
  0x8e   :  { %1341 = vmatpush3.msra.mxu0 %v905_v62 }
  0x8f   :  { %1342 = vmatprep.subr.mxu0 %v1385_v26 }
  0x90   :  { %1343 = vmatpush3.msra.mxu0 %v904_v63 }
  0x91   :  { %1344 = vmatprep.subr.mxu0 %v1385_v26 }
  0x92   :  { %1345 = vmatpush3.msra.mxu0 %v903_v0 }
  0x93   :  { %1346 = vmatprep.subr.mxu0 %v1385_v26 }
  0x94   :  { %1347 = vmatpush3.msra.mxu0 %v902_v30 }
  0x95   :  { %1348 = vmatprep.subr.mxu0 %v1385_v26 }
  0x96   :  { %1349 = vmatpush3.msra.mxu0 %v901_v31 }
  0x97   :  { %1350 = vmatprep.subr.mxu0 %v1385_v26 }
  0x98   :  { %1351 = vmatpush3.msra.mxu0 %v900_v32 }
  0xe2   :  { %v1045_v1 = vpop.f32.mrf.mxu0 }
  0xe4   :  { %v1046_v2 = vpop.f32.mrf.mxu0 }
  0xe5   :  { %v1080_v3 = vpop.f32.mrf.mxu1  ;;  %v1047_v5 = vadd.f32 %v1046_v2, %v1045_v1 }
  0xe7   :  { %v1081_v7 = vpop.f32.mrf.mxu1  ;;  %v382_v10 = vadd.f32 %v1047_v5, %v1008_v6 }
  0xe8   :  { %v1082_v11 = vadd.f32 %v1081_v7, %v1080_v3 }
  0xea   :  { %v452_v15 = vadd.f32 %v1082_v11, %v382_v10 }
 0x104   :  { %v1115_v4 = vpop.f32.mrf.mxu0 }
 0x106   :  { %v1116_v8 = vpop.f32.mrf.mxu0 }
 0x107   :  { %v1117_v13 = vadd.f32 %v1116_v8, %v1115_v4 }
 0x108   :  { %v1150_v9 = vpop.f32.mrf.mxu1 }
 0x109   :  { %v522_v18 = vadd.f32 %v1117_v13, %v452_v15 }
 0x10a   :  { %v1151_v14 = vpop.f32.mrf.mxu1 }
 0x10b   :  { %v1152_v19 = vadd.f32 %v1151_v14, %v1150_v9 }
 0x10d   :  { %v592_v22 = vadd.f32 %v1152_v19, %v522_v18 }
 0x127   :  { %v1185_v12 = vpop.f32.mrf.mxu0 }
 0x129   :  { %v1186_v16 = vpop.f32.mrf.mxu0 }
 0x12a   :  { %v1220_v17 = vpop.f32.mrf.mxu1  ;;  %v1187_v20 = vadd.f32 %v1186_v16, %v1185_v12 }
 0x12c   :  { %v1221_v21 = vpop.f32.mrf.mxu1  ;;  %v662_v48 = vadd.f32 %v1187_v20, %v592_v22 }
 0x12d   :  { %v1222_v23 = vadd.f32 %v1221_v21, %v1220_v17 }
 0x12f   :  { %v732_v24 = vadd.f32 %v1222_v23, %v662_v48 }
 0x138   :  { %v801_v25 = vpop.f32.mrf.mxu0 }
 0x139   :  { %v802_v27 = vadd.f32 %v801_v25, %v732_v24 }
 0x13a   :  { %v1284_v28 = vpop.f32.mrf.mxu0 }
 0x13b   :  { %v805_v29 = vmax.f32 %v802_v27, 0.0 }
 0x13d   :  { %1318 = vmatmul.mubr.f32.vlgmr.msra.gmra.mxu1 %v805_v29 }
 0x1fd   :  { %v895_v34 = vpop.f32.mrf.mxu1 }
 0x1fe   :  { %v896_v35 = vadd.f32 %v1011_v33, %v895_v34 }
 0x1ff   :  { %v1319_v36 = vpop.f32.mrf.mxu1 }
 0x200   :  { %v899_v37 = vmax.f32 %v896_v35, 0.0 }
 0x202   :  { %1353 = vmatmul.mubr.f32.vlgmr.msra.gmra.mxu0 %v899_v37 }
 0x2c2   :  { %v989_v26 = vpop.f32.mrf.mxu0 }
 0x2c3   :  { %v990_v39 = vadd.f32 %v1012_v38, %v989_v26 }
 0x2c4   :  { %v1354_v40 = vpop.f32.mrf.mxu0 }
 0x2c5   :  { %993 = vst [vmem:[#allocation2] sm:$0x3] %v990_v39 }
 0x2c6   :  { %1373 = shalt.err (!%p1370_p4)
}
 0x2c7   :  { %1003 = dma.vmem_to_hbm [thread:$0]  %s1001_s11, 32, %s2209_s7, [#allocation3]  }
 0x2c8   :  { %1382 = dma.done.wait [#allocation3], 32  }
 0x2c9   :  { %1383 = vsyncadd [#allocation3], 4294967264 }
 0x2ca   :  { %1007 = vsyncpa [#allocation3], 1 }

// kernel: cnn24_forward.2
= control target key start
LH: loop header
LB: loop body
LE: loop exit
PB: predicated region body
PF: predicated region fallthrough
CT: control target
= control target key end

     0   :  { %vm132_vm0 = vcmask 1042432   ;;  %v2106_v0 = vmov 0.0   ;;  %vm56_vm1 = vcmask 613376   ;;  %vm2107_vm2 = vmmov 0   ;;  %s3142_s1 = inlined_call_operand.vmem [shape: f32[75,16], index: 1, kind: input, shape index: {}]   ;;  %s3143_s0 = inlined_call_operand.vmem [shape: f32[4,200,75], index: 0, kind: input, shape index: {}]   ;;  %s3144_s2 = inlined_call_operand.vmem [shape: f32[1,16], index: 2, kind: input, shape index: {}]   ;;  %s3145_s3 = inlined_call_operand.vmem [shape: f32[200,16], index: 3, kind: output, shape index: {}]  }
   0x1   :  { %1724 = vmatprep.subr.mxu0 %v2106_v0  ;;  %v2132_v1 = vld [vmem:[%s3142_s1 + $0x48] sm:$0x7]  ;;  %1819 = vmatprep.subr.mxu1 %v2106_v0  ;;  %v2138_v2 = vld [vmem:[%s3142_s1 + $0x40] sm:$0xff]  ;;  %v2149_v3 = vld [vmem:[%s3142_s1 + $0x38] sm:$0xff]  ;;  %vm1374_vm3 = vcmask 130048  }
   0x2   :  { %1725 = vmatpush3.msk.msra.mxu0 %vm132_vm0, %v2132_v1  ;;  %1820 = vmatpush3.msk.msra.mxu1 %vm132_vm0, %v2132_v1  ;;  %v2158_v4 = vld [vmem:[%s3142_s1 + $0x30] sm:$0xff]  ;;  %v2167_v5 = vld [vmem:[%s3142_s1 + $0x28] sm:$0xff]  ;;  %v2176_v6 = vld [vmem:[%s3142_s1 + $0x20] sm:$0xff] }
   0x3   :  { %1726 = vmatprep.subr.mxu0 %v2106_v0  ;;  %1821 = vmatprep.subr.mxu1 %v2106_v0  ;;  %v2185_v7 = vld [vmem:[%s3142_s1 + $0x18] sm:$0xff]  ;;  %v2194_v8 = vld [vmem:[%s3142_s1 + $0x10] sm:$0xff]  ;;  %v2203_v9 = vld [vmem:[%s3142_s1 + $0x8] sm:$0xff] }
   0x4   :  { %1727 = vmatpush3.msra.mxu0 %v2138_v2  ;;  %1822 = vmatpush3.msra.mxu1 %v2138_v2  ;;  %v2212_v10 = vld [vmem:[%s3142_s1] sm:$0xff]  ;;  %v1431_v12 = vld [vmem:[%s3143_s0 + $0xc8] sm:$0xff]  ;;  %v1432_v14 = vld [vmem:[%s3143_s0 + $0xd0] sm:$0xff] }
   0x5   :  { %1728 = vmatprep.subr.mxu0 %v2106_v0  ;;  %1823 = vmatprep.subr.mxu1 %v2106_v0  ;;  %v25_v11 = vld [vmem:[%s3143_s0] sm:$0xff]  ;;  %v26_v13 = vld [vmem:[%s3143_s0 + $0x8] sm:$0xff]  ;;  %v27_v15 = vld [vmem:[%s3143_s0 + $0x10] sm:$0xff] }
   0x6   :  { %1729 = vmatpush3.msra.mxu0 %v2149_v3  ;;  %1824 = vmatpush3.msra.mxu1 %v2149_v3  ;;  %v1433_v16 = vld [vmem:[%s3143_s0 + $0xd8] sm:$0xff]  ;;  %v1434_v18 = vld [vmem:[%s3143_s0 + $0xe0] sm:$0xff]  ;;  %v1435_v20 = vld [vmem:[%s3143_s0 + $0xe8] sm:$0xff] }
   0x7   :  { %1730 = vmatprep.subr.mxu0 %v2106_v0  ;;  %1825 = vmatprep.subr.mxu1 %v2106_v0  ;;  %v28_v17 = vld [vmem:[%s3143_s0 + $0x18] sm:$0xff]  ;;  %v29_v19 = vld [vmem:[%s3143_s0 + $0x20] sm:$0xff]  ;;  %v30_v21 = vld [vmem:[%s3143_s0 + $0x28] sm:$0xff] }
   0x8   :  { %1731 = vmatpush3.msra.mxu0 %v2158_v4  ;;  %1826 = vmatpush3.msra.mxu1 %v2158_v4  ;;  %v1436_v22 = vld [vmem:[%s3143_s0 + $0xf0] sm:$0xff]  ;;  %v1437_v24 = vld [vmem:[%s3143_s0 + $0xf8] sm:$0xff]  ;;  %v1438_v26 = vld [vmem:[%s3143_s0 + $0x100] sm:$0xff] }
   0x9   :  { %1732 = vmatprep.subr.mxu0 %v2106_v0  ;;  %1827 = vmatprep.subr.mxu1 %v2106_v0  ;;  %v31_v23 = vld [vmem:[%s3143_s0 + $0x30] sm:$0xff]  ;;  %v32_v25 = vld [vmem:[%s3143_s0 + $0x38] sm:$0xff]  ;;  %v33_v27 = vld [vmem:[%s3143_s0 + $0x40] sm:$0xff] }
   0xa   :  { %1733 = vmatpush3.msra.mxu0 %v2167_v5  ;;  %1828 = vmatpush3.msra.mxu1 %v2167_v5  ;;  %v1439_v28 = vld [vmem:[%s3143_s0 + $0x108] sm:$0xff]  ;;  %v1440_v30 = vld [vmem:[%s3143_s0 + $0x110] sm:$0xff]  ;;  %v1441_v32 = vld [vmem:[%s3143_s0 + $0x118] sm:$0xff] }
   0xb   :  { %1734 = vmatprep.subr.mxu0 %v2106_v0  ;;  %1829 = vmatprep.subr.mxu1 %v2106_v0  ;;  %v34_v29 = vld [vmem:[%s3143_s0 + $0x48] sm:$0xff]  ;;  %v35_v31 = vld [vmem:[%s3143_s0 + $0x50] sm:$0xff]  ;;  %v36_v33 = vld [vmem:[%s3143_s0 + $0x58] sm:$0xff] }
   0xc   :  { %1735 = vmatpush3.msra.mxu0 %v2176_v6  ;;  %1830 = vmatpush3.msra.mxu1 %v2176_v6  ;;  %v1442_v34 = vld [vmem:[%s3143_s0 + $0x120] sm:$0xff]  ;;  %v1443_v36 = vld [vmem:[%s3143_s0 + $0x128] sm:$0xff]  ;;  %v1444_v38 = vld [vmem:[%s3143_s0 + $0x130] sm:$0xff] }
   0xd   :  { %1736 = vmatprep.subr.mxu0 %v2106_v0  ;;  %1831 = vmatprep.subr.mxu1 %v2106_v0  ;;  %v37_v35 = vld [vmem:[%s3143_s0 + $0x60] sm:$0xff]  ;;  %v38_v37 = vld [vmem:[%s3143_s0 + $0x68] sm:$0xff]  ;;  %v39_v39 = vld [vmem:[%s3143_s0 + $0x70] sm:$0xff] }
   0xe   :  { %1737 = vmatpush3.msra.mxu0 %v2185_v7  ;;  %1832 = vmatpush3.msra.mxu1 %v2185_v7  ;;  %v1445_v40 = vld [vmem:[%s3143_s0 + $0x138] sm:$0xff]  ;;  %v1446_v42 = vld [vmem:[%s3143_s0 + $0x140] sm:$0xff]  ;;  %v1447_v44 = vld [vmem:[%s3143_s0 + $0x148] sm:$0xff] }
   0xf   :  { %1738 = vmatprep.subr.mxu0 %v2106_v0  ;;  %1833 = vmatprep.subr.mxu1 %v2106_v0  ;;  %v40_v41 = vld [vmem:[%s3143_s0 + $0x78] sm:$0xff]  ;;  %v41_v43 = vld [vmem:[%s3143_s0 + $0x80] sm:$0xff]  ;;  %v42_v45 = vld [vmem:[%s3143_s0 + $0x88] sm:$0xff] }
  0x10   :  { %1739 = vmatpush3.msra.mxu0 %v2194_v8  ;;  %1834 = vmatpush3.msra.mxu1 %v2194_v8  ;;  %v1448_v46 = vld [vmem:[%s3143_s0 + $0x150] sm:$0xff]  ;;  %v1449_v48 = vld [vmem:[%s3143_s0 + $0x158] sm:$0xff]  ;;  %v1450_v50 = vld [vmem:[%s3143_s0 + $0x160] sm:$0xff] }
  0x11   :  { %1740 = vmatprep.subr.mxu0 %v2106_v0  ;;  %1835 = vmatprep.subr.mxu1 %v2106_v0  ;;  %v43_v47 = vld [vmem:[%s3143_s0 + $0x90] sm:$0xff]  ;;  %v44_v49 = vld [vmem:[%s3143_s0 + $0x98] sm:$0xff]  ;;  %v45_v51 = vld [vmem:[%s3143_s0 + $0xa0] sm:$0xff] }
  0x12   :  { %1741 = vmatpush3.msra.mxu0 %v2203_v9  ;;  %1836 = vmatpush3.msra.mxu1 %v2203_v9  ;;  %v1451_v52 = vld [vmem:[%s3143_s0 + $0x168] sm:$0xff]  ;;  %v1452_v54 = vld [vmem:[%s3143_s0 + $0x170] sm:$0xff]  ;;  %v1453_v56 = vld [vmem:[%s3143_s0 + $0x178] sm:$0xff] }
  0x13   :  { %1742 = vmatprep.subr.mxu0 %v2106_v0  ;;  %1744 = vmatprep.mubr.msk.f32.mxu0 %vm2107_vm2, %v2106_v0  ;;  %v46_v53 = vld [vmem:[%s3143_s0 + $0xa8] sm:$0xff]  ;;  %v47_v55 = vld [vmem:[%s3143_s0 + $0xb0] sm:$0xff]  ;;  %v48_v57 = vld [vmem:[%s3143_s0 + $0xb8] sm:$0xff] }
  0x14   :  { %1743 = vmatpush3.msra.mxu0 %v2212_v10  ;;  %1837 = vmatprep.subr.mxu1 %v2106_v0  ;;  %v1454_v58 = vld [vmem:[%s3143_s0 + $0x180] sm:$0xff]  ;;  %v1455_v60 = vld [vmem:[%s3143_s0 + $0x188] sm:$0xff]  ;;  %v1482_v61 = vld [vmem:[%s3143_s0 + $0x190] sm:$0xff] }
  0x15   :  { %1745 = vmatmul.mubr.msk.f32.vlgmr.msra.gmra.mxu0 %vm56_vm1, %v25_v11  ;;  %1838 = vmatpush3.msra.mxu1 %v2212_v10  ;;  %v49_v59 = vld [vmem:[%s3143_s0 + $0xc0] sm:$0xff]  ;;  %v1533_v62 = vld [vmem:[%s3143_s0 + $0x258] sm:$0xff]  ;;  %v1539_v11 = vld [vmem:[%s3143_s0 + $0x288] sm:$0xff] }
  0x16   :  { %1839 = vmatprep.mubr.msk.f32.mxu1 %vm2107_vm2, %v2106_v0  ;;  %1914 = vmatprep.subr.mxu0 %v2106_v0  ;;  %v1483_v63 = vld [vmem:[%s3143_s0 + $0x198] sm:$0xff] }
  0x17   :  { %1840 = vmatmul.mubr.msk.f32.vlgmr.msra.gmra.mxu1 %vm56_vm1, %v1431_v12  ;;  %1915 = vmatpush3.msk.msra.mxu0 %vm132_vm0, %v2132_v1  ;;  %v1489_v12 = vld [vmem:[%s3143_s0 + $0x1c8] sm:$0xff] }
  0x18   :  { %2009 = vmatprep.subr.mxu1 %v2106_v0  ;;  %1747 = vmatprep.mubr.msk.f32.mxu0 %vm2107_vm2, %v2106_v0 }
  0x19   :  { %2010 = vmatpush3.msk.msra.mxu1 %vm132_vm0, %v2132_v1  ;;  %1748 = vmatmul.mubr.msk.f32.gmra.mxu0 %vm56_vm1, %v26_v13  ;;  %v1534_v1 = vld [vmem:[%s3143_s0 + $0x260] sm:$0xff]  ;;  %v1540_v13 = vld [vmem:[%s3143_s0 + $0x290] sm:$0xff] }
  0x1a   :  { %1842 = vmatprep.mubr.msk.f32.mxu1 %vm2107_vm2, %v2106_v0  ;;  %1750 = vmatprep.mubr.msk.f32.mxu0 %vm2107_vm2, %v2106_v0 }
  0x1b   :  { %1843 = vmatmul.mubr.msk.f32.gmra.mxu1 %vm56_vm1, %v1432_v14  ;;  %1916 = vmatprep.subr.mxu0 %v2106_v0  ;;  %v1490_v14 = vld [vmem:[%s3143_s0 + $0x1d0] sm:$0xff] }
  0x1c   :  { %1845 = vmatprep.mubr.msk.f32.mxu1 %vm2107_vm2, %v2106_v0  ;;  %1917 = vmatpush3.msra.mxu0 %v2138_v2 }
  0x1d   :  { %1751 = vmatmul.mubr.msk.f32.gmra.mxu0 %vm56_vm1, %v27_v15  ;;  %2011 = vmatprep.subr.mxu1 %v2106_v0  ;;  %v1541_v15 = vld [vmem:[%s3143_s0 + $0x298] sm:$0xff] }
  0x1e   :  { %1753 = vmatprep.mubr.msk.f32.mxu0 %vm2107_vm2, %v2106_v0  ;;  %2012 = vmatpush3.msra.mxu1 %v2138_v2  ;;  %v1484_v2 = vld [vmem:[%s3143_s0 + $0x1a0] sm:$0xff] }
  0x1f   :  { %1846 = vmatmul.mubr.msk.f32.gmra.mxu1 %vm56_vm1, %v1433_v16  ;;  %1918 = vmatprep.subr.mxu0 %v2106_v0  ;;  %v1491_v16 = vld [vmem:[%s3143_s0 + $0x1d8] sm:$0xff] }
  0x20   :  { %1848 = vmatprep.mubr.msk.f32.mxu1 %vm2107_vm2, %v2106_v0  ;;  %1919 = vmatpush3.msra.mxu0 %v2149_v3 }
  0x21   :  { %1754 = vmatmul.mubr.msk.f32.gmra.mxu0 %vm56_vm1, %v28_v17  ;;  %2013 = vmatprep.subr.mxu1 %v2106_v0  ;;  %v1542_v17 = vld [vmem:[%s3143_s0 + $0x2a0] sm:$0xff] }
  0x22   :  { %1756 = vmatprep.mubr.msk.f32.mxu0 %vm2107_vm2, %v2106_v0  ;;  %2014 = vmatpush3.msra.mxu1 %v2149_v3  ;;  %v1535_v3 = vld [vmem:[%s3143_s0 + $0x268] sm:$0xff] }
  0x23   :  { %1849 = vmatmul.mubr.msk.f32.gmra.mxu1 %vm56_vm1, %v1434_v18  ;;  %1920 = vmatprep.subr.mxu0 %v2106_v0  ;;  %v1492_v18 = vld [vmem:[%s3143_s0 + $0x1e0] sm:$0xff] }
  0x24   :  { %1851 = vmatprep.mubr.msk.f32.mxu1 %vm2107_vm2, %v2106_v0  ;;  %1921 = vmatpush3.msra.mxu0 %v2158_v4 }
  0x25   :  { %1757 = vmatmul.mubr.msk.f32.gmra.mxu0 %vm56_vm1, %v29_v19  ;;  %2015 = vmatprep.subr.mxu1 %v2106_v0  ;;  %v1543_v19 = vld [vmem:[%s3143_s0 + $0x2a8] sm:$0xff] }
  0x26   :  { %1759 = vmatprep.mubr.msk.f32.mxu0 %vm2107_vm2, %v2106_v0  ;;  %2016 = vmatpush3.msra.mxu1 %v2158_v4  ;;  %v1485_v4 = vld [vmem:[%s3143_s0 + $0x1a8] sm:$0xff] }
  0x27   :  { %1852 = vmatmul.mubr.msk.f32.gmra.mxu1 %vm56_vm1, %v1435_v20  ;;  %1922 = vmatprep.subr.mxu0 %v2106_v0  ;;  %v1493_v20 = vld [vmem:[%s3143_s0 + $0x1e8] sm:$0xff] }
  0x28   :  { %1854 = vmatprep.mubr.msk.f32.mxu1 %vm2107_vm2, %v2106_v0  ;;  %1923 = vmatpush3.msra.mxu0 %v2167_v5 }
  0x29   :  { %1760 = vmatmul.mubr.msk.f32.gmra.mxu0 %vm56_vm1, %v30_v21  ;;  %2017 = vmatprep.subr.mxu1 %v2106_v0  ;;  %v1544_v21 = vld [vmem:[%s3143_s0 + $0x2b0] sm:$0xff] }
  0x2a   :  { %1762 = vmatprep.mubr.msk.f32.mxu0 %vm2107_vm2, %v2106_v0  ;;  %2018 = vmatpush3.msra.mxu1 %v2167_v5  ;;  %v1536_v5 = vld [vmem:[%s3143_s0 + $0x270] sm:$0xff] }
  0x2b   :  { %1855 = vmatmul.mubr.msk.f32.gmra.mxu1 %vm56_vm1, %v1436_v22  ;;  %1924 = vmatprep.subr.mxu0 %v2106_v0  ;;  %v1494_v22 = vld [vmem:[%s3143_s0 + $0x1f0] sm:$0xff] }
  0x2c   :  { %1857 = vmatprep.mubr.msk.f32.mxu1 %vm2107_vm2, %v2106_v0  ;;  %1925 = vmatpush3.msra.mxu0 %v2176_v6 }
  0x2d   :  { %1763 = vmatmul.mubr.msk.f32.gmra.mxu0 %vm56_vm1, %v31_v23  ;;  %2019 = vmatprep.subr.mxu1 %v2106_v0  ;;  %v1545_v23 = vld [vmem:[%s3143_s0 + $0x2b8] sm:$0xff] }
  0x2e   :  { %1765 = vmatprep.mubr.msk.f32.mxu0 %vm2107_vm2, %v2106_v0  ;;  %2020 = vmatpush3.msra.mxu1 %v2176_v6  ;;  %v1486_v6 = vld [vmem:[%s3143_s0 + $0x1b0] sm:$0xff] }
  0x2f   :  { %1858 = vmatmul.mubr.msk.f32.gmra.mxu1 %vm56_vm1, %v1437_v24  ;;  %1926 = vmatprep.subr.mxu0 %v2106_v0  ;;  %v1495_v24 = vld [vmem:[%s3143_s0 + $0x1f8] sm:$0xff] }
  0x30   :  { %1860 = vmatprep.mubr.msk.f32.mxu1 %vm2107_vm2, %v2106_v0  ;;  %1927 = vmatpush3.msra.mxu0 %v2185_v7 }
  0x31   :  { %1766 = vmatmul.mubr.msk.f32.gmra.mxu0 %vm56_vm1, %v32_v25  ;;  %2021 = vmatprep.subr.mxu1 %v2106_v0  ;;  %v1546_v25 = vld [vmem:[%s3143_s0 + $0x2c0] sm:$0xff] }
  0x32   :  { %1768 = vmatprep.mubr.msk.f32.mxu0 %vm2107_vm2, %v2106_v0  ;;  %2022 = vmatpush3.msra.mxu1 %v2185_v7  ;;  %v1537_v7 = vld [vmem:[%s3143_s0 + $0x278] sm:$0xff] }
  0x33   :  { %1861 = vmatmul.mubr.msk.f32.gmra.mxu1 %vm56_vm1, %v1438_v26  ;;  %1928 = vmatprep.subr.mxu0 %v2106_v0  ;;  %v1496_v26 = vld [vmem:[%s3143_s0 + $0x200] sm:$0xff] }
  0x34   :  { %1863 = vmatprep.mubr.msk.f32.mxu1 %vm2107_vm2, %v2106_v0  ;;  %1929 = vmatpush3.msra.mxu0 %v2194_v8 }
  0x35   :  { %1769 = vmatmul.mubr.msk.f32.gmra.mxu0 %vm56_vm1, %v33_v27  ;;  %2023 = vmatprep.subr.mxu1 %v2106_v0  ;;  %v1547_v27 = vld [vmem:[%s3143_s0 + $0x2c8] sm:$0xff] }
  0x36   :  { %1771 = vmatprep.mubr.msk.f32.mxu0 %vm2107_vm2, %v2106_v0  ;;  %2024 = vmatpush3.msra.mxu1 %v2194_v8  ;;  %v1487_v8 = vld [vmem:[%s3143_s0 + $0x1b8] sm:$0xff] }
  0x37   :  { %1864 = vmatmul.mubr.msk.f32.gmra.mxu1 %vm56_vm1, %v1439_v28  ;;  %1930 = vmatprep.subr.mxu0 %v2106_v0  ;;  %v1497_v28 = vld [vmem:[%s3143_s0 + $0x208] sm:$0xff] }
  0x38   :  { %1866 = vmatprep.mubr.msk.f32.mxu1 %vm2107_vm2, %v2106_v0  ;;  %1931 = vmatpush3.msra.mxu0 %v2203_v9 }
  0x39   :  { %1772 = vmatmul.mubr.msk.f32.gmra.mxu0 %vm56_vm1, %v34_v29  ;;  %2025 = vmatprep.subr.mxu1 %v2106_v0  ;;  %v1548_v29 = vld [vmem:[%s3143_s0 + $0x2d0] sm:$0xff] }
  0x3a   :  { %1774 = vmatprep.mubr.msk.f32.mxu0 %vm2107_vm2, %v2106_v0  ;;  %2026 = vmatpush3.msra.mxu1 %v2203_v9  ;;  %v1538_v9 = vld [vmem:[%s3143_s0 + $0x280] sm:$0xff] }
  0x3b   :  { %1867 = vmatmul.mubr.msk.f32.gmra.mxu1 %vm56_vm1, %v1440_v30  ;;  %1932 = vmatprep.subr.mxu0 %v2106_v0  ;;  %v1498_v30 = vld [vmem:[%s3143_s0 + $0x210] sm:$0xff] }
  0x3c   :  { %1869 = vmatprep.mubr.msk.f32.mxu1 %vm2107_vm2, %v2106_v0  ;;  %1933 = vmatpush3.msra.mxu0 %v2212_v10 }
  0x3d   :  { %1775 = vmatmul.mubr.msk.f32.gmra.mxu0 %vm56_vm1, %v35_v31  ;;  %2027 = vmatprep.subr.mxu1 %v2106_v0  ;;  %v1549_v31 = vld [vmem:[%s3143_s0 + $0x2d8] sm:$0xff] }
  0x3e   :  { %1777 = vmatprep.mubr.msk.f32.mxu0 %vm2107_vm2, %v2106_v0  ;;  %2028 = vmatpush3.msra.mxu1 %v2212_v10  ;;  %v1488_v10 = vld [vmem:[%s3143_s0 + $0x1c0] sm:$0xff] }
  0x3f   :  { %1870 = vmatmul.mubr.msk.f32.gmra.mxu1 %vm56_vm1, %v1441_v32  ;;  %v1499_v32 = vld [vmem:[%s3143_s0 + $0x218] sm:$0xff] }
  0x40   :  { %1872 = vmatprep.mubr.msk.f32.mxu1 %vm2107_vm2, %v2106_v0 }
  0x41   :  { %1778 = vmatmul.mubr.msk.f32.gmra.mxu0 %vm56_vm1, %v36_v33  ;;  %v1550_v33 = vld [vmem:[%s3143_s0 + $0x2e0] sm:$0xff] }
  0x42   :  { %1780 = vmatprep.mubr.msk.f32.mxu0 %vm2107_vm2, %v2106_v0 }
  0x43   :  { %1873 = vmatmul.mubr.msk.f32.gmra.mxu1 %vm56_vm1, %v1442_v34  ;;  %v1500_v34 = vld [vmem:[%s3143_s0 + $0x220] sm:$0xff] }
  0x44   :  { %1875 = vmatprep.mubr.msk.f32.mxu1 %vm2107_vm2, %v2106_v0 }
  0x45   :  { %1781 = vmatmul.mubr.msk.f32.gmra.mxu0 %vm56_vm1, %v37_v35  ;;  %v1551_v35 = vld [vmem:[%s3143_s0 + $0x2e8] sm:$0xff] }
  0x46   :  { %1783 = vmatprep.mubr.msk.f32.mxu0 %vm2107_vm2, %v2106_v0 }
  0x47   :  { %1876 = vmatmul.mubr.msk.f32.gmra.mxu1 %vm56_vm1, %v1443_v36  ;;  %v1501_v36 = vld [vmem:[%s3143_s0 + $0x228] sm:$0xff] }
  0x48   :  { %1878 = vmatprep.mubr.msk.f32.mxu1 %vm2107_vm2, %v2106_v0 }
  0x49   :  { %1784 = vmatmul.mubr.msk.f32.gmra.mxu0 %vm56_vm1, %v38_v37  ;;  %v1552_v37 = vld [vmem:[%s3143_s0 + $0x2f0] sm:$0xff] }
  0x4a   :  { %1786 = vmatprep.mubr.msk.f32.mxu0 %vm2107_vm2, %v2106_v0 }
  0x4b   :  { %1879 = vmatmul.mubr.msk.f32.gmra.mxu1 %vm56_vm1, %v1444_v38  ;;  %v1502_v38 = vld [vmem:[%s3143_s0 + $0x230] sm:$0xff] }
  0x4c   :  { %1881 = vmatprep.mubr.msk.f32.mxu1 %vm2107_vm2, %v2106_v0 }
  0x4d   :  { %1787 = vmatmul.mubr.msk.f32.gmra.mxu0 %vm56_vm1, %v39_v39  ;;  %v1553_v39 = vld [vmem:[%s3143_s0 + $0x2f8] sm:$0xff] }
  0x4e   :  { %1789 = vmatprep.mubr.msk.f32.mxu0 %vm2107_vm2, %v2106_v0 }
  0x4f   :  { %1882 = vmatmul.mubr.msk.f32.gmra.mxu1 %vm56_vm1, %v1445_v40  ;;  %v1503_v40 = vld [vmem:[%s3143_s0 + $0x238] sm:$0xff] }
  0x50   :  { %1884 = vmatprep.mubr.msk.f32.mxu1 %vm2107_vm2, %v2106_v0 }
  0x51   :  { %1790 = vmatmul.mubr.msk.f32.gmra.mxu0 %vm56_vm1, %v40_v41  ;;  %v1554_v41 = vld [vmem:[%s3143_s0 + $0x300] sm:$0xff] }
  0x52   :  { %1792 = vmatprep.mubr.msk.f32.mxu0 %vm2107_vm2, %v2106_v0 }
  0x53   :  { %1885 = vmatmul.mubr.msk.f32.gmra.mxu1 %vm56_vm1, %v1446_v42  ;;  %v1504_v42 = vld [vmem:[%s3143_s0 + $0x240] sm:$0xff] }
  0x54   :  { %1887 = vmatprep.mubr.msk.f32.mxu1 %vm2107_vm2, %v2106_v0 }
  0x55   :  { %1793 = vmatmul.mubr.msk.f32.gmra.mxu0 %vm56_vm1, %v41_v43  ;;  %v1555_v43 = vld [vmem:[%s3143_s0 + $0x308] sm:$0xff] }
  0x56   :  { %1795 = vmatprep.mubr.msk.f32.mxu0 %vm2107_vm2, %v2106_v0 }
  0x57   :  { %1888 = vmatmul.mubr.msk.f32.gmra.mxu1 %vm56_vm1, %v1447_v44  ;;  %v1505_v44 = vld [vmem:[%s3143_s0 + $0x248] sm:$0xff] }
  0x58   :  { %1890 = vmatprep.mubr.msk.f32.mxu1 %vm2107_vm2, %v2106_v0 }
  0x59   :  { %1796 = vmatmul.mubr.msk.f32.gmra.mxu0 %vm56_vm1, %v42_v45  ;;  %v2846_v45 = vld [vmem:[%s3144_s2] ss:$0 sm:$0xff] }
  0x5a   :  { %1798 = vmatprep.mubr.msk.f32.mxu0 %vm2107_vm2, %v2106_v0 }
  0x5b   :  { %1891 = vmatmul.mubr.msk.f32.gmra.mxu1 %vm56_vm1, %v1448_v46  ;;  %v1556_v46 = vld [vmem:[%s3143_s0 + $0x310] sm:$0xff] }
  0x5c   :  { %1893 = vmatprep.mubr.msk.f32.mxu1 %vm2107_vm2, %v2106_v0 }
  0x5d   :  { %1799 = vmatmul.mubr.msk.f32.gmra.mxu0 %vm56_vm1, %v43_v47 }
  0x5e   :  { %1801 = vmatprep.mubr.msk.f32.mxu0 %vm2107_vm2, %v2106_v0 }
  0x5f   :  { %1894 = vmatmul.mubr.msk.f32.gmra.mxu1 %vm56_vm1, %v1449_v48 }
  0x60   :  { %1896 = vmatprep.mubr.msk.f32.mxu1 %vm2107_vm2, %v2106_v0 }
  0x61   :  { %1802 = vmatmul.mubr.msk.f32.gmra.mxu0 %vm56_vm1, %v44_v49  ;;  %v1506_v49 = vld [vmem:[%s3143_s0 + $0x250] sm:$0xff] }
  0x62   :  { %1804 = vmatprep.mubr.msk.f32.mxu0 %vm2107_vm2, %v2106_v0 }
  0x63   :  { %1897 = vmatmul.mubr.msk.f32.gmra.mxu1 %vm56_vm1, %v1450_v50 }
  0x64   :  { %1899 = vmatprep.mubr.msk.f32.mxu1 %vm2107_vm2, %v2106_v0 }
  0x65   :  { %1805 = vmatmul.mubr.msk.f32.gmra.mxu0 %vm56_vm1, %v45_v51 }
  0x66   :  { %1807 = vmatprep.mubr.msk.f32.mxu0 %vm2107_vm2, %v2106_v0 }
  0x67   :  { %1900 = vmatmul.mubr.msk.f32.gmra.mxu1 %vm56_vm1, %v1451_v52 }
  0x68   :  { %1902 = vmatprep.mubr.msk.f32.mxu1 %vm2107_vm2, %v2106_v0 }
  0x69   :  { %1808 = vmatmul.mubr.msk.f32.gmra.mxu0 %vm56_vm1, %v46_v53 }
  0x6a   :  { %1810 = vmatprep.mubr.msk.f32.mxu0 %vm2107_vm2, %v2106_v0 }
  0x6b   :  { %1903 = vmatmul.mubr.msk.f32.gmra.mxu1 %vm56_vm1, %v1452_v54  ;;  %v1557_v54 = vld [vmem:[%s3143_s0 + $0x318] sm:$0xff] }
  0x6c   :  { %1905 = vmatprep.mubr.msk.f32.mxu1 %vm2107_vm2, %v2106_v0 }
  0x6d   :  { %1811 = vmatmul.mubr.msk.f32.gmra.mxu0 %vm56_vm1, %v47_v55 }
  0x6e   :  { %1813 = vmatprep.mubr.msk.f32.mxu0 %vm2107_vm2, %v2106_v0 }
  0x6f   :  { %1906 = vmatmul.mubr.msk.f32.gmra.mxu1 %vm56_vm1, %v1453_v56 }
  0x70   :  { %1908 = vmatprep.mubr.msk.f32.mxu1 %vm2107_vm2, %v2106_v0 }
  0x71   :  { %1814 = vmatmul.mubr.msk.f32.gmra.mxu0 %vm56_vm1, %v48_v57 }
  0x72   :  { %1816 = vmatprep.mubr.msk.f32.mxu0 %vm2107_vm2, %v2106_v0 }
  0x73   :  { %1909 = vmatmul.mubr.msk.f32.gmra.mxu1 %vm56_vm1, %v1454_v58 }
  0x74   :  { %1911 = vmatprep.mubr.msk.f32.mxu1 %vm2107_vm2, %v2106_v0 }
  0x75   :  { %1817 = vmatmul.mubr.msk.f32.gmra.mxu0 %vm56_vm1, %v49_v59 }
  0x76   :  { %1934 = vmatprep.mubr.msk.f32.mxu0 %vm2107_vm2, %v2106_v0 }
  0x77   :  { %1912 = vmatmul.mubr.msk.f32.gmra.mxu1 %vm56_vm1, %v1455_v60 }
  0x78   :  { %2029 = vmatprep.mubr.msk.f32.mxu1 %vm2107_vm2, %v2106_v0 }
  0x79   :  { %1935 = vmatmul.mubr.msk.f32.vlgmr.msra.gmra.mxu0 %vm56_vm1, %v1482_v61 }
  0x7a   :  { %1937 = vmatprep.mubr.msk.f32.mxu0 %vm2107_vm2, %v2106_v0 }
  0x7b   :  { %2030 = vmatmul.mubr.msk.f32.vlgmr.msra.gmra.mxu1 %vm56_vm1, %v1533_v62 }
  0x7c   :  { %2032 = vmatprep.mubr.msk.f32.mxu1 %vm2107_vm2, %v2106_v0 }
  0x7d   :  { %1938 = vmatmul.mubr.msk.f32.gmra.mxu0 %vm56_vm1, %v1483_v63 }
  0x7e   :  { %1940 = vmatprep.mubr.msk.f32.mxu0 %vm2107_vm2, %v2106_v0 }
  0x7f   :  { %2033 = vmatmul.mubr.msk.f32.gmra.mxu1 %vm56_vm1, %v1534_v1 }
  0x80   :  { %2035 = vmatprep.mubr.msk.f32.mxu1 %vm2107_vm2, %v2106_v0 }
  0x81   :  { %1941 = vmatmul.mubr.msk.f32.gmra.mxu0 %vm56_vm1, %v1484_v2 }
  0x82   :  { %1943 = vmatprep.mubr.msk.f32.mxu0 %vm2107_vm2, %v2106_v0 }
  0x83   :  { %2036 = vmatmul.mubr.msk.f32.gmra.mxu1 %vm56_vm1, %v1535_v3 }
  0x84   :  { %2038 = vmatprep.mubr.msk.f32.mxu1 %vm2107_vm2, %v2106_v0 }
  0x85   :  { %1944 = vmatmul.mubr.msk.f32.gmra.mxu0 %vm56_vm1, %v1485_v4 }
  0x86   :  { %1946 = vmatprep.mubr.msk.f32.mxu0 %vm2107_vm2, %v2106_v0 }
  0x87   :  { %2039 = vmatmul.mubr.msk.f32.gmra.mxu1 %vm56_vm1, %v1536_v5 }
  0x88   :  { %2041 = vmatprep.mubr.msk.f32.mxu1 %vm2107_vm2, %v2106_v0 }
  0x89   :  { %1947 = vmatmul.mubr.msk.f32.gmra.mxu0 %vm56_vm1, %v1486_v6 }
  0x8a   :  { %1949 = vmatprep.mubr.msk.f32.mxu0 %vm2107_vm2, %v2106_v0 }
  0x8b   :  { %2042 = vmatmul.mubr.msk.f32.gmra.mxu1 %vm56_vm1, %v1537_v7 }
  0x8c   :  { %2044 = vmatprep.mubr.msk.f32.mxu1 %vm2107_vm2, %v2106_v0 }
  0x8d   :  { %1950 = vmatmul.mubr.msk.f32.gmra.mxu0 %vm56_vm1, %v1487_v8 }
  0x8e   :  { %1952 = vmatprep.mubr.msk.f32.mxu0 %vm2107_vm2, %v2106_v0 }
  0x8f   :  { %2045 = vmatmul.mubr.msk.f32.gmra.mxu1 %vm56_vm1, %v1538_v9 }
  0x90   :  { %2047 = vmatprep.mubr.msk.f32.mxu1 %vm2107_vm2, %v2106_v0 }
  0x91   :  { %1953 = vmatmul.mubr.msk.f32.gmra.mxu0 %vm56_vm1, %v1488_v10 }
  0x92   :  { %1955 = vmatprep.mubr.msk.f32.mxu0 %vm2107_vm2, %v2106_v0 }
  0x93   :  { %2048 = vmatmul.mubr.msk.f32.gmra.mxu1 %vm56_vm1, %v1539_v11 }
  0x94   :  { %2050 = vmatprep.mubr.msk.f32.mxu1 %vm2107_vm2, %v2106_v0 }
  0x95   :  { %1956 = vmatmul.mubr.msk.f32.gmra.mxu0 %vm56_vm1, %v1489_v12 }
  0x96   :  { %1958 = vmatprep.mubr.msk.f32.mxu0 %vm2107_vm2, %v2106_v0 }
  0x97   :  { %2051 = vmatmul.mubr.msk.f32.gmra.mxu1 %vm56_vm1, %v1540_v13 }
  0x98   :  { %2053 = vmatprep.mubr.msk.f32.mxu1 %vm2107_vm2, %v2106_v0 }
  0x99   :  { %1959 = vmatmul.mubr.msk.f32.gmra.mxu0 %vm56_vm1, %v1490_v14 }
  0x9a   :  { %1961 = vmatprep.mubr.msk.f32.mxu0 %vm2107_vm2, %v2106_v0 }
  0x9b   :  { %2054 = vmatmul.mubr.msk.f32.gmra.mxu1 %vm56_vm1, %v1541_v15 }
  0x9c   :  { %2056 = vmatprep.mubr.msk.f32.mxu1 %vm2107_vm2, %v2106_v0 }
  0x9d   :  { %1962 = vmatmul.mubr.msk.f32.gmra.mxu0 %vm56_vm1, %v1491_v16 }
  0x9e   :  { %1964 = vmatprep.mubr.msk.f32.mxu0 %vm2107_vm2, %v2106_v0 }
  0x9f   :  { %2057 = vmatmul.mubr.msk.f32.gmra.mxu1 %vm56_vm1, %v1542_v17 }
  0xa0   :  { %2059 = vmatprep.mubr.msk.f32.mxu1 %vm2107_vm2, %v2106_v0 }
  0xa1   :  { %1965 = vmatmul.mubr.msk.f32.gmra.mxu0 %vm56_vm1, %v1492_v18 }
  0xa2   :  { %1967 = vmatprep.mubr.msk.f32.mxu0 %vm2107_vm2, %v2106_v0 }
  0xa3   :  { %2060 = vmatmul.mubr.msk.f32.gmra.mxu1 %vm56_vm1, %v1543_v19 }
  0xa4   :  { %2062 = vmatprep.mubr.msk.f32.mxu1 %vm2107_vm2, %v2106_v0 }
  0xa5   :  { %1968 = vmatmul.mubr.msk.f32.gmra.mxu0 %vm56_vm1, %v1493_v20 }
  0xa6   :  { %1970 = vmatprep.mubr.msk.f32.mxu0 %vm2107_vm2, %v2106_v0 }
  0xa7   :  { %2063 = vmatmul.mubr.msk.f32.gmra.mxu1 %vm56_vm1, %v1544_v21 }
  0xa8   :  { %2065 = vmatprep.mubr.msk.f32.mxu1 %vm2107_vm2, %v2106_v0 }
  0xa9   :  { %1971 = vmatmul.mubr.msk.f32.gmra.mxu0 %vm56_vm1, %v1494_v22 }
  0xaa   :  { %1973 = vmatprep.mubr.msk.f32.mxu0 %vm2107_vm2, %v2106_v0 }
  0xab   :  { %2066 = vmatmul.mubr.msk.f32.gmra.mxu1 %vm56_vm1, %v1545_v23 }
  0xac   :  { %2068 = vmatprep.mubr.msk.f32.mxu1 %vm2107_vm2, %v2106_v0 }
  0xad   :  { %1974 = vmatmul.mubr.msk.f32.gmra.mxu0 %vm56_vm1, %v1495_v24 }
  0xae   :  { %1976 = vmatprep.mubr.msk.f32.mxu0 %vm2107_vm2, %v2106_v0 }
  0xaf   :  { %2069 = vmatmul.mubr.msk.f32.gmra.mxu1 %vm56_vm1, %v1546_v25 }
  0xb0   :  { %2071 = vmatprep.mubr.msk.f32.mxu1 %vm2107_vm2, %v2106_v0 }
  0xb1   :  { %1977 = vmatmul.mubr.msk.f32.gmra.mxu0 %vm56_vm1, %v1496_v26 }
  0xb2   :  { %1979 = vmatprep.mubr.msk.f32.mxu0 %vm2107_vm2, %v2106_v0 }
  0xb3   :  { %2072 = vmatmul.mubr.msk.f32.gmra.mxu1 %vm56_vm1, %v1547_v27 }
  0xb4   :  { %2074 = vmatprep.mubr.msk.f32.mxu1 %vm2107_vm2, %v2106_v0 }
  0xb5   :  { %1980 = vmatmul.mubr.msk.f32.gmra.mxu0 %vm56_vm1, %v1497_v28 }
  0xb6   :  { %1982 = vmatprep.mubr.msk.f32.mxu0 %vm2107_vm2, %v2106_v0 }
  0xb7   :  { %2075 = vmatmul.mubr.msk.f32.gmra.mxu1 %vm56_vm1, %v1548_v29 }
  0xb8   :  { %2077 = vmatprep.mubr.msk.f32.mxu1 %vm2107_vm2, %v2106_v0 }
  0xb9   :  { %1983 = vmatmul.mubr.msk.f32.gmra.mxu0 %vm56_vm1, %v1498_v30 }
  0xba   :  { %1985 = vmatprep.mubr.msk.f32.mxu0 %vm2107_vm2, %v2106_v0 }
  0xbb   :  { %2078 = vmatmul.mubr.msk.f32.gmra.mxu1 %vm56_vm1, %v1549_v31 }
  0xbc   :  { %2080 = vmatprep.mubr.msk.f32.mxu1 %vm2107_vm2, %v2106_v0 }
  0xbd   :  { %1986 = vmatmul.mubr.msk.f32.gmra.mxu0 %vm56_vm1, %v1499_v32 }
  0xbe   :  { %1988 = vmatprep.mubr.msk.f32.mxu0 %vm2107_vm2, %v2106_v0 }
  0xbf   :  { %2081 = vmatmul.mubr.msk.f32.gmra.mxu1 %vm56_vm1, %v1550_v33 }
  0xc0   :  { %2083 = vmatprep.mubr.msk.f32.mxu1 %vm2107_vm2, %v2106_v0 }
  0xc1   :  { %1989 = vmatmul.mubr.msk.f32.gmra.mxu0 %vm56_vm1, %v1500_v34 }
  0xc2   :  { %1991 = vmatprep.mubr.msk.f32.mxu0 %vm2107_vm2, %v2106_v0 }
  0xc3   :  { %2084 = vmatmul.mubr.msk.f32.gmra.mxu1 %vm56_vm1, %v1551_v35 }
  0xc4   :  { %2086 = vmatprep.mubr.msk.f32.mxu1 %vm2107_vm2, %v2106_v0 }
  0xc5   :  { %1992 = vmatmul.mubr.msk.f32.gmra.mxu0 %vm56_vm1, %v1501_v36 }
  0xc6   :  { %1994 = vmatprep.mubr.msk.f32.mxu0 %vm2107_vm2, %v2106_v0 }
  0xc7   :  { %2087 = vmatmul.mubr.msk.f32.gmra.mxu1 %vm56_vm1, %v1552_v37 }
  0xc8   :  { %2089 = vmatprep.mubr.msk.f32.mxu1 %vm2107_vm2, %v2106_v0 }
  0xc9   :  { %1995 = vmatmul.mubr.msk.f32.gmra.mxu0 %vm56_vm1, %v1502_v38 }
  0xca   :  { %1997 = vmatprep.mubr.msk.f32.mxu0 %vm2107_vm2, %v2106_v0 }
  0xcb   :  { %2090 = vmatmul.mubr.msk.f32.gmra.mxu1 %vm56_vm1, %v1553_v39 }
  0xcc   :  { %2092 = vmatprep.mubr.msk.f32.mxu1 %vm2107_vm2, %v2106_v0 }
  0xcd   :  { %1998 = vmatmul.mubr.msk.f32.gmra.mxu0 %vm56_vm1, %v1503_v40 }
  0xce   :  { %2000 = vmatprep.mubr.msk.f32.mxu0 %vm2107_vm2, %v2106_v0 }
  0xcf   :  { %2093 = vmatmul.mubr.msk.f32.gmra.mxu1 %vm56_vm1, %v1554_v41 }
  0xd0   :  { %2095 = vmatprep.mubr.msk.f32.mxu1 %vm2107_vm2, %v2106_v0 }
  0xd1   :  { %2001 = vmatmul.mubr.msk.f32.gmra.mxu0 %vm56_vm1, %v1504_v42 }
  0xd2   :  { %2003 = vmatprep.mubr.msk.f32.mxu0 %vm2107_vm2, %v2106_v0 }
  0xd3   :  { %2096 = vmatmul.mubr.msk.f32.gmra.mxu1 %vm56_vm1, %v1555_v43 }
  0xd4   :  { %2098 = vmatprep.mubr.msk.f32.mxu1 %vm2107_vm2, %v2106_v0 }
  0xd5   :  { %v202_v47 = vpop.f32.mrf.mxu0  ;;  %2004 = vmatmul.mubr.msk.f32.gmra.mxu0 %vm56_vm1, %v1505_v44 }
  0xd6   :  { %v203_v48 = vadd.f32 %v2846_v45, %v202_v47  ;;  %2006 = vmatprep.mubr.msk.f32.mxu0 %vm2107_vm2, %v2106_v0 }
  0xd7   :  { %v518_v50 = vpop.f32.mrf.mxu1  ;;  %2099 = vmatmul.mubr.msk.f32.gmra.mxu1 %vm56_vm1, %v1556_v46  ;;  %v1746_v51 = vpop.f32.mrf.mxu0 }
  0xd8   :  { %v326_v52 = vmax.f32 %v203_v48, 0.0  ;;  %v519_v53 = vadd.f32 %v2846_v45, %v518_v50  ;;  %2101 = vmatprep.mubr.msk.f32.mxu1 %vm2107_vm2, %v2106_v0 }
  0xd9   :  { %v1841_v55 = vpop.f32.mrf.mxu1  ;;  %v207_v56 = vpop.f32.mrf.mxu0  ;;  %2007 = vmatmul.mubr.msk.f32.gmra.mxu0 %vm56_vm1, %v1506_v49 }
  0xda   :  { %v642_v57 = vmax.f32 %v519_v53, 0.0  ;;  %v208_v58 = vadd.f32 %v2846_v45, %v207_v56 }
  0xdb   :  { %v523_v59 = vpop.f32.mrf.mxu1  ;;  %2102 = vmatmul.mubr.msk.f32.gmra.mxu1 %vm56_vm1, %v1557_v54  ;;  %v1749_v60 = vpop.f32.mrf.mxu0 }
  0xdc   :  { %v2870_v61 = vmax.f32 %v326_v52, %v642_v57  ;;  %v327_v62 = vmax.f32 %v208_v58, 0.0  ;;  %v524_v0 = vadd.f32 %v2846_v45, %v523_v59 }
  0xdd   :  { %v1844_v63 = vpop.f32.mrf.mxu1  ;;  %v212_v1 = vpop.f32.mrf.mxu0 }
  0xde   :  { %v643_v2 = vmax.f32 %v524_v0, 0.0  ;;  %v213_v3 = vadd.f32 %v2846_v45, %v212_v1 }
  0xdf   :  { %v528_v4 = vpop.f32.mrf.mxu1  ;;  %v1752_v5 = vpop.f32.mrf.mxu0 }
  0xe0   :  { %v2874_v6 = vmax.f32 %v327_v62, %v643_v2  ;;  %v328_v7 = vmax.f32 %v213_v3, 0.0  ;;  %v529_v8 = vadd.f32 %v2846_v45, %v528_v4 }
  0xe1   :  { %v1847_v9 = vpop.f32.mrf.mxu1  ;;  %v217_v10 = vpop.f32.mrf.mxu0 }
  0xe2   :  { %v644_v11 = vmax.f32 %v529_v8, 0.0  ;;  %v218_v12 = vadd.f32 %v2846_v45, %v217_v10 }
  0xe3   :  { %v533_v13 = vpop.f32.mrf.mxu1  ;;  %v1755_v14 = vpop.f32.mrf.mxu0 }
  0xe4   :  { %v2878_v15 = vmax.f32 %v328_v7, %v644_v11  ;;  %v329_v16 = vmax.f32 %v218_v12, 0.0  ;;  %v534_v17 = vadd.f32 %v2846_v45, %v533_v13 }
  0xe5   :  { %v1850_v18 = vpop.f32.mrf.mxu1  ;;  %v222_v19 = vpop.f32.mrf.mxu0 }
  0xe6   :  { %v645_v20 = vmax.f32 %v534_v17, 0.0  ;;  %v223_v21 = vadd.f32 %v2846_v45, %v222_v19 }
  0xe7   :  { %v538_v22 = vpop.f32.mrf.mxu1  ;;  %v1758_v23 = vpop.f32.mrf.mxu0 }
  0xe8   :  { %v2882_v24 = vmax.f32 %v329_v16, %v645_v20  ;;  %v330_v25 = vmax.f32 %v223_v21, 0.0  ;;  %v539_v26 = vadd.f32 %v2846_v45, %v538_v22 }
  0xe9   :  { %v1853_v27 = vpop.f32.mrf.mxu1  ;;  %v227_v28 = vpop.f32.mrf.mxu0 }
  0xea   :  { %v646_v29 = vmax.f32 %v539_v26, 0.0  ;;  %v228_v30 = vadd.f32 %v2846_v45, %v227_v28 }
  0xeb   :  { %v543_v31 = vpop.f32.mrf.mxu1  ;;  %v1761_v32 = vpop.f32.mrf.mxu0 }
  0xec   :  { %v2886_v33 = vmax.f32 %v330_v25, %v646_v29  ;;  %v331_v34 = vmax.f32 %v228_v30, 0.0  ;;  %v544_v35 = vadd.f32 %v2846_v45, %v543_v31 }
  0xed   :  { %v1856_v36 = vpop.f32.mrf.mxu1  ;;  %v232_v37 = vpop.f32.mrf.mxu0 }
  0xee   :  { %v647_v38 = vmax.f32 %v544_v35, 0.0  ;;  %v233_v39 = vadd.f32 %v2846_v45, %v232_v37 }
  0xef   :  { %v548_v40 = vpop.f32.mrf.mxu1  ;;  %v1764_v41 = vpop.f32.mrf.mxu0 }
  0xf0   :  { %v2890_v42 = vmax.f32 %v331_v34, %v647_v38  ;;  %v332_v43 = vmax.f32 %v233_v39, 0.0  ;;  %v549_v44 = vadd.f32 %v2846_v45, %v548_v40 }
  0xf1   :  { %v1859_v46 = vpop.f32.mrf.mxu1  ;;  %v237_v47 = vpop.f32.mrf.mxu0 }
  0xf2   :  { %v648_v48 = vmax.f32 %v549_v44, 0.0  ;;  %v238_v49 = vadd.f32 %v2846_v45, %v237_v47 }
  0xf3   :  { %v553_v50 = vpop.f32.mrf.mxu1  ;;  %v1767_v51 = vpop.f32.mrf.mxu0 }
  0xf4   :  { %v2894_v52 = vmax.f32 %v332_v43, %v648_v48  ;;  %v333_v53 = vmax.f32 %v238_v49, 0.0  ;;  %v554_v54 = vadd.f32 %v2846_v45, %v553_v50 }
  0xf5   :  { %v1862_v55 = vpop.f32.mrf.mxu1  ;;  %v242_v56 = vpop.f32.mrf.mxu0 }
  0xf6   :  { %v649_v57 = vmax.f32 %v554_v54, 0.0  ;;  %v243_v58 = vadd.f32 %v2846_v45, %v242_v56 }
  0xf7   :  { %v558_v59 = vpop.f32.mrf.mxu1  ;;  %v1770_v60 = vpop.f32.mrf.mxu0 }
  0xf8   :  { %v2898_v62 = vmax.f32 %v333_v53, %v649_v57  ;;  %v334_v0 = vmax.f32 %v243_v58, 0.0  ;;  %v559_v63 = vadd.f32 %v2846_v45, %v558_v59 }
  0xf9   :  { %v1865_v1 = vpop.f32.mrf.mxu1  ;;  %v247_v2 = vpop.f32.mrf.mxu0 }
  0xfa   :  { %v650_v3 = vmax.f32 %v559_v63, 0.0  ;;  %v248_v4 = vadd.f32 %v2846_v45, %v247_v2 }
  0xfb   :  { %v563_v5 = vpop.f32.mrf.mxu1  ;;  %v1773_v7 = vpop.f32.mrf.mxu0 }
  0xfc   :  { %v2902_v8 = vmax.f32 %v334_v0, %v650_v3  ;;  %v335_v9 = vmax.f32 %v248_v4, 0.0  ;;  %v564_v10 = vadd.f32 %v2846_v45, %v563_v5 }
  0xfd   :  { %v1868_v11 = vpop.f32.mrf.mxu1  ;;  %v252_v12 = vpop.f32.mrf.mxu0 }
  0xfe   :  { %v651_v13 = vmax.f32 %v564_v10, 0.0  ;;  %v253_v14 = vadd.f32 %v2846_v45, %v252_v12 }
  0xff   :  { %v568_v16 = vpop.f32.mrf.mxu1  ;;  %v1776_v17 = vpop.f32.mrf.mxu0 }
 0x100   :  { %v2906_v18 = vmax.f32 %v335_v9, %v651_v13  ;;  %v336_v19 = vmax.f32 %v253_v14, 0.0  ;;  %v569_v20 = vadd.f32 %v2846_v45, %v568_v16 }
 0x101   :  { %v1871_v21 = vpop.f32.mrf.mxu1  ;;  %v257_v22 = vpop.f32.mrf.mxu0 }
 0x102   :  { %v652_v23 = vmax.f32 %v569_v20, 0.0  ;;  %v258_v25 = vadd.f32 %v2846_v45, %v257_v22 }
 0x103   :  { %v573_v26 = vpop.f32.mrf.mxu1  ;;  %v1779_v27 = vpop.f32.mrf.mxu0 }
 0x104   :  { %v2910_v28 = vmax.f32 %v336_v19, %v652_v23  ;;  %v337_v29 = vmax.f32 %v258_v25, 0.0  ;;  %v574_v30 = vadd.f32 %v2846_v45, %v573_v26 }
 0x105   :  { %v1874_v31 = vpop.f32.mrf.mxu1  ;;  %v262_v32 = vpop.f32.mrf.mxu0 }
 0x106   :  { %v653_v34 = vmax.f32 %v574_v30, 0.0  ;;  %v263_v35 = vadd.f32 %v2846_v45, %v262_v32 }
 0x107   :  { %v578_v36 = vpop.f32.mrf.mxu1  ;;  %v1782_v37 = vpop.f32.mrf.mxu0 }
 0x108   :  { %v2914_v38 = vmax.f32 %v337_v29, %v653_v34  ;;  %v338_v39 = vmax.f32 %v263_v35, 0.0  ;;  %v579_v40 = vadd.f32 %v2846_v45, %v578_v36 }
 0x109   :  { %v1877_v41 = vpop.f32.mrf.mxu1  ;;  %v267_v43 = vpop.f32.mrf.mxu0 }
 0x10a   :  { %v654_v44 = vmax.f32 %v579_v40, 0.0  ;;  %v268_v46 = vadd.f32 %v2846_v45, %v267_v43 }
 0x10b   :  { %v583_v47 = vpop.f32.mrf.mxu1  ;;  %v1785_v48 = vpop.f32.mrf.mxu0 }
 0x10c   :  { %v2918_v49 = vmax.f32 %v338_v39, %v654_v44  ;;  %v339_v50 = vmax.f32 %v268_v46, 0.0  ;;  %v584_v51 = vadd.f32 %v2846_v45, %v583_v47 }
 0x10d   :  { %v1880_v53 = vpop.f32.mrf.mxu1  ;;  %v272_v54 = vpop.f32.mrf.mxu0 }
 0x10e   :  { %v655_v55 = vmax.f32 %v584_v51, 0.0  ;;  %v273_v56 = vadd.f32 %v2846_v45, %v272_v54 }
 0x10f   :  { %v588_v57 = vpop.f32.mrf.mxu1  ;;  %v1788_v58 = vpop.f32.mrf.mxu0 }
 0x110   :  { %v2922_v59 = vmax.f32 %v339_v50, %v655_v55  ;;  %v340_v60 = vmax.f32 %v273_v56, 0.0  ;;  %v589_v0 = vadd.f32 %v2846_v45, %v588_v57 }
 0x111   :  { %v1883_v63 = vpop.f32.mrf.mxu1  ;;  %v277_v1 = vpop.f32.mrf.mxu0 }
 0x112   :  { %v656_v2 = vmax.f32 %v589_v0, 0.0  ;;  %v278_v3 = vadd.f32 %v2846_v45, %v277_v1 }
 0x113   :  { %v593_v4 = vpop.f32.mrf.mxu1  ;;  %v1791_v5 = vpop.f32.mrf.mxu0 }
 0x114   :  { %v2926_v7 = vmax.f32 %v340_v60, %v656_v2  ;;  %v341_v9 = vmax.f32 %v278_v3, 0.0  ;;  %v594_v10 = vadd.f32 %v2846_v45, %v593_v4 }
 0x115   :  { %v1886_v11 = vpop.f32.mrf.mxu1  ;;  %v282_v12 = vpop.f32.mrf.mxu0 }
 0x116   :  { %v657_v13 = vmax.f32 %v594_v10, 0.0  ;;  %v283_v14 = vadd.f32 %v2846_v45, %v282_v12 }
 0x117   :  { %v598_v16 = vpop.f32.mrf.mxu1  ;;  %v1794_v17 = vpop.f32.mrf.mxu0 }
 0x118   :  { %v2930_v19 = vmax.f32 %v341_v9, %v657_v13  ;;  %v342_v20 = vmax.f32 %v283_v14, 0.0  ;;  %v599_v21 = vadd.f32 %v2846_v45, %v598_v16 }
 0x119   :  { %v1889_v22 = vpop.f32.mrf.mxu1  ;;  %v287_v23 = vpop.f32.mrf.mxu0 }
 0x11a   :  { %v658_v25 = vmax.f32 %v599_v21, 0.0  ;;  %v288_v26 = vadd.f32 %v2846_v45, %v287_v23 }
 0x11b   :  { %v603_v27 = vpop.f32.mrf.mxu1  ;;  %v1797_v29 = vpop.f32.mrf.mxu0 }
 0x11c   :  { %v2934_v30 = vmax.f32 %v342_v20, %v658_v25  ;;  %v343_v31 = vmax.f32 %v288_v26, 0.0  ;;  %v604_v32 = vadd.f32 %v2846_v45, %v603_v27 }
 0x11d   :  { %v1892_v34 = vpop.f32.mrf.mxu1  ;;  %v292_v35 = vpop.f32.mrf.mxu0 }
 0x11e   :  { %v659_v36 = vmax.f32 %v604_v32, 0.0  ;;  %v293_v37 = vadd.f32 %v2846_v45, %v292_v35 }
 0x11f   :  { %v608_v39 = vpop.f32.mrf.mxu1  ;;  %v1800_v40 = vpop.f32.mrf.mxu0 }
 0x120   :  { %v2938_v41 = vmax.f32 %v343_v31, %v659_v36  ;;  %v344_v43 = vmax.f32 %v293_v37, 0.0  ;;  %v609_v44 = vadd.f32 %v2846_v45, %v608_v39 }
 0x121   :  { %v1895_v46 = vpop.f32.mrf.mxu1  ;;  %v297_v47 = vpop.f32.mrf.mxu0 }
 0x122   :  { %v660_v48 = vmax.f32 %v609_v44, 0.0  ;;  %v298_v50 = vadd.f32 %v2846_v45, %v297_v47 }
 0x123   :  { %v613_v51 = vpop.f32.mrf.mxu1  ;;  %v1803_v53 = vpop.f32.mrf.mxu0 }
 0x124   :  { %v2942_v54 = vmax.f32 %v344_v43, %v660_v48  ;;  %v345_v55 = vmax.f32 %v298_v50, 0.0  ;;  %v614_v56 = vadd.f32 %v2846_v45, %v613_v51 }
 0x125   :  { %v1898_v57 = vpop.f32.mrf.mxu1  ;;  %v302_v58 = vpop.f32.mrf.mxu0 }
 0x126   :  { %v661_v60 = vmax.f32 %v614_v56, 0.0  ;;  %v303_v0 = vadd.f32 %v2846_v45, %v302_v58 }
 0x127   :  { %v618_v63 = vpop.f32.mrf.mxu1  ;;  %v1806_v1 = vpop.f32.mrf.mxu0 }
 0x128   :  { %v2946_v2 = vmax.f32 %v345_v55, %v661_v60  ;;  %v346_v3 = vmax.f32 %v303_v0, 0.0  ;;  %v619_v4 = vadd.f32 %v2846_v45, %v618_v63 }
 0x129   :  { %v1901_v5 = vpop.f32.mrf.mxu1  ;;  %v307_v9 = vpop.f32.mrf.mxu0 }
 0x12a   :  { %v662_v10 = vmax.f32 %v619_v4, 0.0  ;;  %v308_v11 = vadd.f32 %v2846_v45, %v307_v9 }
 0x12b   :  { %v623_v12 = vpop.f32.mrf.mxu1  ;;  %v1809_v13 = vpop.f32.mrf.mxu0 }
 0x12c   :  { %v2950_v14 = vmax.f32 %v346_v3, %v662_v10  ;;  %v347_v16 = vmax.f32 %v308_v11, 0.0  ;;  %v624_v17 = vadd.f32 %v2846_v45, %v623_v12 }
 0x12d   :  { %v1904_v20 = vpop.f32.mrf.mxu1  ;;  %v312_v21 = vpop.f32.mrf.mxu0 }
 0x12e   :  { %v663_v22 = vmax.f32 %v624_v17, 0.0  ;;  %v313_v23 = vadd.f32 %v2846_v45, %v312_v21 }
 0x12f   :  { %v628_v25 = vpop.f32.mrf.mxu1  ;;  %v1812_v26 = vpop.f32.mrf.mxu0 }
 0x130   :  { %v2954_v27 = vmax.f32 %v347_v16, %v663_v22  ;;  %v348_v29 = vmax.f32 %v313_v23, 0.0  ;;  %v629_v31 = vadd.f32 %v2846_v45, %v628_v25 }
 0x131   :  { %v1907_v32 = vpop.f32.mrf.mxu1  ;;  %v317_v34 = vpop.f32.mrf.mxu0 }
 0x132   :  { %v664_v35 = vmax.f32 %v629_v31, 0.0  ;;  %v318_v36 = vadd.f32 %v2846_v45, %v317_v34 }
 0x133   :  { %v633_v37 = vpop.f32.mrf.mxu1  ;;  %v1815_v39 = vpop.f32.mrf.mxu0 }
 0x134   :  { %v2958_v40 = vmax.f32 %v348_v29, %v664_v35  ;;  %v349_v43 = vmax.f32 %v318_v36, 0.0  ;;  %v634_v44 = vadd.f32 %v2846_v45, %v633_v37 }
 0x135   :  { %v1910_v46 = vpop.f32.mrf.mxu1  ;;  %v322_v47 = vpop.f32.mrf.mxu0 }
 0x136   :  { %v665_v48 = vmax.f32 %v634_v44, 0.0  ;;  %v323_v50 = vadd.f32 %v2846_v45, %v322_v47 }
 0x137   :  { %v638_v51 = vpop.f32.mrf.mxu1  ;;  %v1818_v53 = vpop.f32.mrf.mxu0 }
 0x138   :  { %v2962_v55 = vmax.f32 %v349_v43, %v665_v48  ;;  %v350_v56 = vmax.f32 %v323_v50, 0.0  ;;  %v639_v57 = vadd.f32 %v2846_v45, %v638_v51 }
 0x139   :  { %v1913_v58 = vpop.f32.mrf.mxu1  ;;  %v859_v60 = vpop.f32.mrf.mxu0 }
 0x13a   :  { %v666_v0 = vmax.f32 %v639_v57, 0.0  ;;  %v860_v63 = vadd.f32 %v2846_v45, %v859_v60 }
 0x13b   :  { %v1200_v1 = vpop.f32.mrf.mxu1  ;;  %v1936_v3 = vpop.f32.mrf.mxu0 }
 0x13c   :  { %v2966_v4 = vmax.f32 %v350_v56, %v666_v0  ;;  %v983_v5 = vmax.f32 %v860_v63, 0.0  ;;  %v1201_v9 = vadd.f32 %v2846_v45, %v1200_v1 }
 0x13d   :  { %v2031_v10 = vpop.f32.mrf.mxu1  ;;  %v864_v11 = vpop.f32.mrf.mxu0 }
 0x13e   :  { %v1008_v12 = vmax.f32 %v2870_v61, %v983_v5  ;;  %v1324_v13 = vmax.f32 %v1201_v9, 0.0  ;;  %v865_v16 = vadd.f32 %v2846_v45, %v864_v11 }
 0x13f   :  { %v1205_v17 = vpop.f32.mrf.mxu1  ;;  %v1939_v20 = vpop.f32.mrf.mxu0 }
 0x140   :  { %v1349_v21 = vmax.f32 %v1008_v12, %v1324_v13  ;;  %v984_v22 = vmax.f32 %v865_v16, 0.0  ;;  %v1206_v23 = vadd.f32 %v2846_v45, %v1205_v17 }
 0x141   :  { %v2034_v25 = vpop.f32.mrf.mxu1  ;;  %v869_v26 = vpop.f32.mrf.mxu0 }
 0x142   :  { %1375 = vst.msk [vmem:[%s3145_s3] sm:$0xff] %vm1374_vm3, %v1349_v21  ;;  %v1009_v29 = vmax.f32 %v2874_v6, %v984_v22  ;;  %v1325_v61 = vmax.f32 %v1206_v23, 0.0  ;;  %v870_v31 = vadd.f32 %v2846_v45, %v869_v26 }
 0x143   :  { %v1210_v32 = vpop.f32.mrf.mxu1  ;;  %v1942_v34 = vpop.f32.mrf.mxu0 }
 0x144   :  { %v1350_v35 = vmax.f32 %v1009_v29, %v1325_v61  ;;  %v985_v36 = vmax.f32 %v870_v31, 0.0  ;;  %v1211_v37 = vadd.f32 %v2846_v45, %v1210_v32 }
 0x145   :  { %v2037_v39 = vpop.f32.mrf.mxu1  ;;  %v874_v43 = vpop.f32.mrf.mxu0 }
 0x146   :  { %1376 = vst.msk [vmem:[%s3145_s3 + $0x8] sm:$0xff] %vm1374_vm3, %v1350_v35  ;;  %v1010_v44 = vmax.f32 %v2878_v15, %v985_v36  ;;  %v1326_v46 = vmax.f32 %v1211_v37, 0.0  ;;  %v875_v6 = vadd.f32 %v2846_v45, %v874_v43 }
 0x147   :  { %v1215_v47 = vpop.f32.mrf.mxu1  ;;  %v1945_v48 = vpop.f32.mrf.mxu0 }
 0x148   :  { %v1351_v50 = vmax.f32 %v1010_v44, %v1326_v46  ;;  %v986_v51 = vmax.f32 %v875_v6, 0.0  ;;  %v1216_v53 = vadd.f32 %v2846_v45, %v1215_v47 }
 0x149   :  { %v2040_v56 = vpop.f32.mrf.mxu1  ;;  %v879_v57 = vpop.f32.mrf.mxu0 }
 0x14a   :  { %1377 = vst.msk [vmem:[%s3145_s3 + $0x10] sm:$0xff] %vm1374_vm3, %v1351_v50  ;;  %v1011_v58 = vmax.f32 %v2882_v24, %v986_v51  ;;  %v1327_v60 = vmax.f32 %v1216_v53, 0.0  ;;  %v880_v15 = vadd.f32 %v2846_v45, %v879_v57 }
 0x14b   :  { %v1220_v0 = vpop.f32.mrf.mxu1  ;;  %v1948_v63 = vpop.f32.mrf.mxu0 }
 0x14c   :  { %v1352_v1 = vmax.f32 %v1011_v58, %v1327_v60  ;;  %v987_v3 = vmax.f32 %v880_v15, 0.0  ;;  %v1221_v5 = vadd.f32 %v2846_v45, %v1220_v0 }
 0x14d   :  { %v2043_v9 = vpop.f32.mrf.mxu1  ;;  %v884_v10 = vpop.f32.mrf.mxu0 }
 0x14e   :  { %1378 = vst.msk [vmem:[%s3145_s3 + $0x18] sm:$0xff] %vm1374_vm3, %v1352_v1  ;;  %v1012_v11 = vmax.f32 %v2886_v33, %v987_v3  ;;  %v1328_v12 = vmax.f32 %v1221_v5, 0.0  ;;  %v885_v24 = vadd.f32 %v2846_v45, %v884_v10 }
 0x14f   :  { %v1225_v13 = vpop.f32.mrf.mxu1  ;;  %v1951_v16 = vpop.f32.mrf.mxu0 }
 0x150   :  { %v1353_v17 = vmax.f32 %v1012_v11, %v1328_v12  ;;  %v988_v20 = vmax.f32 %v885_v24, 0.0  ;;  %v1226_v21 = vadd.f32 %v2846_v45, %v1225_v13 }
 0x151   :  { %v2046_v22 = vpop.f32.mrf.mxu1  ;;  %v889_v23 = vpop.f32.mrf.mxu0 }
 0x152   :  { %1379 = vst.msk [vmem:[%s3145_s3 + $0x20] sm:$0xff] %vm1374_vm3, %v1353_v17  ;;  %v1013_v25 = vmax.f32 %v2890_v42, %v988_v20  ;;  %v1329_v26 = vmax.f32 %v1226_v21, 0.0  ;;  %v890_v33 = vadd.f32 %v2846_v45, %v889_v23 }
 0x153   :  { %v1230_v29 = vpop.f32.mrf.mxu1  ;;  %v1954_v61 = vpop.f32.mrf.mxu0 }
 0x154   :  { %v1354_v31 = vmax.f32 %v1013_v25, %v1329_v26  ;;  %v989_v32 = vmax.f32 %v890_v33, 0.0  ;;  %v1231_v34 = vadd.f32 %v2846_v45, %v1230_v29 }
 0x155   :  { %v2049_v35 = vpop.f32.mrf.mxu1  ;;  %v894_v36 = vpop.f32.mrf.mxu0 }
 0x156   :  { %1380 = vst.msk [vmem:[%s3145_s3 + $0x28] sm:$0xff] %vm1374_vm3, %v1354_v31  ;;  %v1014_v37 = vmax.f32 %v2894_v52, %v989_v32  ;;  %v1330_v39 = vmax.f32 %v1231_v34, 0.0  ;;  %v895_v42 = vadd.f32 %v2846_v45, %v894_v36 }
 0x157   :  { %v1235_v43 = vpop.f32.mrf.mxu1  ;;  %v1957_v44 = vpop.f32.mrf.mxu0 }
 0x158   :  { %v1355_v46 = vmax.f32 %v1014_v37, %v1330_v39  ;;  %v990_v6 = vmax.f32 %v895_v42, 0.0  ;;  %v1236_v47 = vadd.f32 %v2846_v45, %v1235_v43 }
 0x159   :  { %v2052_v48 = vpop.f32.mrf.mxu1  ;;  %v899_v50 = vpop.f32.mrf.mxu0 }
 0x15a   :  { %1381 = vst.msk [vmem:[%s3145_s3 + $0x30] sm:$0xff] %vm1374_vm3, %v1355_v46  ;;  %v1015_v51 = vmax.f32 %v2898_v62, %v990_v6  ;;  %v1331_v53 = vmax.f32 %v1236_v47, 0.0  ;;  %v900_v52 = vadd.f32 %v2846_v45, %v899_v50 }
 0x15b   :  { %v1240_v56 = vpop.f32.mrf.mxu1  ;;  %v1960_v57 = vpop.f32.mrf.mxu0 }
 0x15c   :  { %v1356_v58 = vmax.f32 %v1015_v51, %v1331_v53  ;;  %v991_v60 = vmax.f32 %v900_v52, 0.0  ;;  %v1241_v15 = vadd.f32 %v2846_v45, %v1240_v56 }
 0x15d   :  { %v2055_v0 = vpop.f32.mrf.mxu1  ;;  %v904_v63 = vpop.f32.mrf.mxu0 }
 0x15e   :  { %1382 = vst.msk [vmem:[%s3145_s3 + $0x38] sm:$0xff] %vm1374_vm3, %v1356_v58  ;;  %v1016_v1 = vmax.f32 %v2902_v8, %v991_v60  ;;  %v1332_v3 = vmax.f32 %v1241_v15, 0.0  ;;  %v905_v62 = vadd.f32 %v2846_v45, %v904_v63 }
 0x15f   :  { %v1245_v5 = vpop.f32.mrf.mxu1  ;;  %v1963_v9 = vpop.f32.mrf.mxu0 }
 0x160   :  { %v1357_v10 = vmax.f32 %v1016_v1, %v1332_v3  ;;  %v992_v11 = vmax.f32 %v905_v62, 0.0  ;;  %v1246_v12 = vadd.f32 %v2846_v45, %v1245_v5 }
 0x161   :  { %v2058_v24 = vpop.f32.mrf.mxu1  ;;  %v909_v13 = vpop.f32.mrf.mxu0 }
 0x162   :  { %1383 = vst.msk [vmem:[%s3145_s3 + $0x40] sm:$0xff] %vm1374_vm3, %v1357_v10  ;;  %v1017_v16 = vmax.f32 %v2906_v18, %v992_v11  ;;  %v1333_v17 = vmax.f32 %v1246_v12, 0.0  ;;  %v910_v8 = vadd.f32 %v2846_v45, %v909_v13 }
 0x163   :  { %v1250_v20 = vpop.f32.mrf.mxu1  ;;  %v1966_v21 = vpop.f32.mrf.mxu0 }
 0x164   :  { %v1358_v22 = vmax.f32 %v1017_v16, %v1333_v17  ;;  %v993_v23 = vmax.f32 %v910_v8, 0.0  ;;  %v1251_v25 = vadd.f32 %v2846_v45, %v1250_v20 }
 0x165   :  { %v2061_v26 = vpop.f32.mrf.mxu1  ;;  %v914_v33 = vpop.f32.mrf.mxu0 }
 0x166   :  { %1384 = vst.msk [vmem:[%s3145_s3 + $0x48] sm:$0xff] %vm1374_vm3, %v1358_v22  ;;  %v1018_v29 = vmax.f32 %v2910_v28, %v993_v23  ;;  %v1334_v61 = vmax.f32 %v1251_v25, 0.0  ;;  %v915_v18 = vadd.f32 %v2846_v45, %v914_v33 }
 0x167   :  { %v1255_v31 = vpop.f32.mrf.mxu1  ;;  %v1969_v32 = vpop.f32.mrf.mxu0 }
 0x168   :  { %v1359_v34 = vmax.f32 %v1018_v29, %v1334_v61  ;;  %v994_v35 = vmax.f32 %v915_v18, 0.0  ;;  %v1256_v36 = vadd.f32 %v2846_v45, %v1255_v31 }
 0x169   :  { %v2064_v37 = vpop.f32.mrf.mxu1  ;;  %v919_v39 = vpop.f32.mrf.mxu0 }
 0x16a   :  { %1385 = vst.msk [vmem:[%s3145_s3 + $0x50] sm:$0xff] %vm1374_vm3, %v1359_v34  ;;  %v1019_v42 = vmax.f32 %v2914_v38, %v994_v35  ;;  %v1335_v43 = vmax.f32 %v1256_v36, 0.0  ;;  %v920_v28 = vadd.f32 %v2846_v45, %v919_v39 }
 0x16b   :  { %v1260_v44 = vpop.f32.mrf.mxu1  ;;  %v1972_v46 = vpop.f32.mrf.mxu0 }
 0x16c   :  { %v1360_v6 = vmax.f32 %v1019_v42, %v1335_v43  ;;  %v995_v47 = vmax.f32 %v920_v28, 0.0  ;;  %v1261_v48 = vadd.f32 %v2846_v45, %v1260_v44 }
 0x16d   :  { %v2067_v50 = vpop.f32.mrf.mxu1  ;;  %v924_v51 = vpop.f32.mrf.mxu0 }
 0x16e   :  { %1386 = vst.msk [vmem:[%s3145_s3 + $0x58] sm:$0xff] %vm1374_vm3, %v1360_v6  ;;  %v1020_v53 = vmax.f32 %v2918_v49, %v995_v47  ;;  %v1336_v52 = vmax.f32 %v1261_v48, 0.0  ;;  %v925_v38 = vadd.f32 %v2846_v45, %v924_v51 }
 0x16f   :  { %v1265_v56 = vpop.f32.mrf.mxu1  ;;  %v1975_v57 = vpop.f32.mrf.mxu0 }
 0x170   :  { %v1361_v58 = vmax.f32 %v1020_v53, %v1336_v52  ;;  %v996_v60 = vmax.f32 %v925_v38, 0.0  ;;  %v1266_v15 = vadd.f32 %v2846_v45, %v1265_v56 }
 0x171   :  { %v2070_v0 = vpop.f32.mrf.mxu1  ;;  %v929_v63 = vpop.f32.mrf.mxu0 }
 0x172   :  { %1387 = vst.msk [vmem:[%s3145_s3 + $0x60] sm:$0xff] %vm1374_vm3, %v1361_v58  ;;  %v1021_v1 = vmax.f32 %v2922_v59, %v996_v60  ;;  %v1337_v3 = vmax.f32 %v1266_v15, 0.0  ;;  %v930_v49 = vadd.f32 %v2846_v45, %v929_v63 }
 0x173   :  { %v1270_v62 = vpop.f32.mrf.mxu1  ;;  %v1978_v5 = vpop.f32.mrf.mxu0 }
 0x174   :  { %v1362_v9 = vmax.f32 %v1021_v1, %v1337_v3  ;;  %v997_v10 = vmax.f32 %v930_v49, 0.0  ;;  %v1271_v11 = vadd.f32 %v2846_v45, %v1270_v62 }
 0x175   :  { %v2073_v12 = vpop.f32.mrf.mxu1  ;;  %v934_v24 = vpop.f32.mrf.mxu0 }
 0x176   :  { %1388 = vst.msk [vmem:[%s3145_s3 + $0x68] sm:$0xff] %vm1374_vm3, %v1362_v9  ;;  %v1022_v13 = vmax.f32 %v2926_v7, %v997_v10  ;;  %v1338_v16 = vmax.f32 %v1271_v11, 0.0  ;;  %v935_v59 = vadd.f32 %v2846_v45, %v934_v24 }
 0x177   :  { %v1275_v17 = vpop.f32.mrf.mxu1  ;;  %v1981_v8 = vpop.f32.mrf.mxu0 }
 0x178   :  { %v1363_v20 = vmax.f32 %v1022_v13, %v1338_v16  ;;  %v998_v21 = vmax.f32 %v935_v59, 0.0  ;;  %v1276_v22 = vadd.f32 %v2846_v45, %v1275_v17 }
 0x179   :  { %v2076_v23 = vpop.f32.mrf.mxu1  ;;  %v939_v25 = vpop.f32.mrf.mxu0 }
 0x17a   :  { %1389 = vst.msk [vmem:[%s3145_s3 + $0x70] sm:$0xff] %vm1374_vm3, %v1363_v20  ;;  %v1023_v26 = vmax.f32 %v2930_v19, %v998_v21  ;;  %v1339_v33 = vmax.f32 %v1276_v22, 0.0  ;;  %v940_v7 = vadd.f32 %v2846_v45, %v939_v25 }
 0x17b   :  { %v1280_v29 = vpop.f32.mrf.mxu1  ;;  %v1984_v61 = vpop.f32.mrf.mxu0 }
 0x17c   :  { %v1364_v18 = vmax.f32 %v1023_v26, %v1339_v33  ;;  %v999_v31 = vmax.f32 %v940_v7, 0.0  ;;  %v1281_v32 = vadd.f32 %v2846_v45, %v1280_v29 }
 0x17d   :  { %v2079_v34 = vpop.f32.mrf.mxu1  ;;  %v944_v35 = vpop.f32.mrf.mxu0 }
 0x17e   :  { %1390 = vst.msk [vmem:[%s3145_s3 + $0x78] sm:$0xff] %vm1374_vm3, %v1364_v18  ;;  %v1024_v36 = vmax.f32 %v2934_v30, %v999_v31  ;;  %v1340_v37 = vmax.f32 %v1281_v32, 0.0  ;;  %v945_v19 = vadd.f32 %v2846_v45, %v944_v35 }
 0x17f   :  { %v1285_v39 = vpop.f32.mrf.mxu1  ;;  %v1987_v42 = vpop.f32.mrf.mxu0 }
 0x180   :  { %v1365_v43 = vmax.f32 %v1024_v36, %v1340_v37  ;;  %v1000_v28 = vmax.f32 %v945_v19, 0.0  ;;  %v1286_v44 = vadd.f32 %v2846_v45, %v1285_v39 }
 0x181   :  { %v2082_v46 = vpop.f32.mrf.mxu1  ;;  %v949_v6 = vpop.f32.mrf.mxu0 }
 0x182   :  { %1391 = vst.msk [vmem:[%s3145_s3 + $0x80] sm:$0xff] %vm1374_vm3, %v1365_v43  ;;  %v1025_v47 = vmax.f32 %v2938_v41, %v1000_v28  ;;  %v1341_v48 = vmax.f32 %v1286_v44, 0.0  ;;  %v950_v30 = vadd.f32 %v2846_v45, %v949_v6 }
 0x183   :  { %v1290_v50 = vpop.f32.mrf.mxu1  ;;  %v1990_v51 = vpop.f32.mrf.mxu0 }
 0x184   :  { %v1366_v53 = vmax.f32 %v1025_v47, %v1341_v48  ;;  %v1001_v52 = vmax.f32 %v950_v30, 0.0  ;;  %v1291_v38 = vadd.f32 %v2846_v45, %v1290_v50 }
 0x185   :  { %v2085_v56 = vpop.f32.mrf.mxu1  ;;  %v954_v57 = vpop.f32.mrf.mxu0 }
 0x186   :  { %1392 = vst.msk [vmem:[%s3145_s3 + $0x88] sm:$0xff] %vm1374_vm3, %v1366_v53  ;;  %v1026_v58 = vmax.f32 %v2942_v54, %v1001_v52  ;;  %v1342_v60 = vmax.f32 %v1291_v38, 0.0  ;;  %v955_v41 = vadd.f32 %v2846_v45, %v954_v57 }
 0x187   :  { %v1295_v15 = vpop.f32.mrf.mxu1  ;;  %v1993_v0 = vpop.f32.mrf.mxu0 }
 0x188   :  { %v1367_v63 = vmax.f32 %v1026_v58, %v1342_v60  ;;  %v1002_v1 = vmax.f32 %v955_v41, 0.0  ;;  %v1296_v3 = vadd.f32 %v2846_v45, %v1295_v15 }
 0x189   :  { %v2088_v49 = vpop.f32.mrf.mxu1  ;;  %v959_v62 = vpop.f32.mrf.mxu0 }
 0x18a   :  { %1393 = vst.msk [vmem:[%s3145_s3 + $0x90] sm:$0xff] %vm1374_vm3, %v1367_v63  ;;  %v1027_v5 = vmax.f32 %v2946_v2, %v1002_v1  ;;  %v1343_v9 = vmax.f32 %v1296_v3, 0.0  ;;  %v960_v54 = vadd.f32 %v2846_v45, %v959_v62 }
 0x18b   :  { %v1300_v10 = vpop.f32.mrf.mxu1  ;;  %v1996_v11 = vpop.f32.mrf.mxu0 }
 0x18c   :  { %v1368_v12 = vmax.f32 %v1027_v5, %v1343_v9  ;;  %v1003_v24 = vmax.f32 %v960_v54, 0.0  ;;  %v1301_v13 = vadd.f32 %v2846_v45, %v1300_v10 }
 0x18d   :  { %v2091_v16 = vpop.f32.mrf.mxu1  ;;  %v964_v59 = vpop.f32.mrf.mxu0 }
 0x18e   :  { %1394 = vst.msk [vmem:[%s3145_s3 + $0x98] sm:$0xff] %vm1374_vm3, %v1368_v12  ;;  %v1028_v17 = vmax.f32 %v2950_v14, %v1003_v24  ;;  %v1344_v8 = vmax.f32 %v1301_v13, 0.0  ;;  %v965_v2 = vadd.f32 %v2846_v45, %v964_v59 }
 0x18f   :  { %v1305_v20 = vpop.f32.mrf.mxu1  ;;  %v1999_v21 = vpop.f32.mrf.mxu0 }
 0x190   :  { %v1369_v22 = vmax.f32 %v1028_v17, %v1344_v8  ;;  %v1004_v23 = vmax.f32 %v965_v2, 0.0  ;;  %v1306_v25 = vadd.f32 %v2846_v45, %v1305_v20 }
 0x191   :  { %v2094_v26 = vpop.f32.mrf.mxu1  ;;  %v969_v33 = vpop.f32.mrf.mxu0 }
 0x192   :  { %1395 = vst.msk [vmem:[%s3145_s3 + $0xa0] sm:$0xff] %vm1374_vm3, %v1369_v22  ;;  %v1029_v7 = vmax.f32 %v2954_v27, %v1004_v23  ;;  %v1345_v29 = vmax.f32 %v1306_v25, 0.0  ;;  %v970_v14 = vadd.f32 %v2846_v45, %v969_v33 }
 0x193   :  { %v1310_v61 = vpop.f32.mrf.mxu1  ;;  %v2002_v18 = vpop.f32.mrf.mxu0 }
 0x194   :  { %v1370_v31 = vmax.f32 %v1029_v7, %v1345_v29  ;;  %v1005_v32 = vmax.f32 %v970_v14, 0.0  ;;  %v1311_v34 = vadd.f32 %v2846_v45, %v1310_v61 }
 0x195   :  { %v2097_v35 = vpop.f32.mrf.mxu1  ;;  %v974_v36 = vpop.f32.mrf.mxu0 }
 0x196   :  { %1396 = vst.msk [vmem:[%s3145_s3 + $0xa8] sm:$0xff] %vm1374_vm3, %v1370_v31  ;;  %v1030_v37 = vmax.f32 %v2958_v40, %v1005_v32  ;;  %v1346_v19 = vmax.f32 %v1311_v34, 0.0  ;;  %v975_v27 = vadd.f32 %v2846_v45, %v974_v36 }
 0x197   :  { %v1315_v39 = vpop.f32.mrf.mxu1  ;;  %v2005_v42 = vpop.f32.mrf.mxu0 }
 0x198   :  { %v1371_v43 = vmax.f32 %v1030_v37, %v1346_v19  ;;  %v1006_v28 = vmax.f32 %v975_v27, 0.0  ;;  %v1316_v44 = vadd.f32 %v2846_v45, %v1315_v39 }
 0x199   :  { %v2100_v46 = vpop.f32.mrf.mxu1  ;;  %v979_v6 = vpop.f32.mrf.mxu0 }
 0x19a   :  { %1397 = vst.msk [vmem:[%s3145_s3 + $0xb0] sm:$0xff] %vm1374_vm3, %v1371_v43  ;;  %v1031_v47 = vmax.f32 %v2962_v55, %v1006_v28  ;;  %v1347_v48 = vmax.f32 %v1316_v44, 0.0  ;;  %v980_v40 = vadd.f32 %v2846_v45, %v979_v6 }
 0x19b   :  { %v1320_v30 = vpop.f32.mrf.mxu1  ;;  %v2008_v50 = vpop.f32.mrf.mxu0 }
 0x19c   :  { %v1372_v51 = vmax.f32 %v1031_v47, %v1347_v48  ;;  %v1007_v53 = vmax.f32 %v980_v40, 0.0  ;;  %v1321_v52 = vadd.f32 %v2846_v45, %v1320_v30 }
 0x19d   :  { %v2103_v38 = vpop.f32.mrf.mxu1 }
 0x19e   :  { %1398 = vst.msk [vmem:[%s3145_s3 + $0xb8] sm:$0xff] %vm1374_vm3, %v1372_v51  ;;  %v1032_v56 = vmax.f32 %v2966_v4, %v1007_v53  ;;  %v1348_v57 = vmax.f32 %v1321_v52, 0.0 }
 0x1a0   :  { %v1373_v58 = vmax.f32 %v1032_v56, %v1348_v57 }
 0x1a2   :  { %1399 = vst.msk [vmem:[%s3145_s3 + $0xc0] sm:$0xff] %vm1374_vm3, %v1373_v58 }

</bundles_post_ra>
